<compile_context>
chip_gen: v7x
topology: tpu7x:2x2x1
jax: 0.10.0
libtpu: 0.0.40
codegen_flags: <defaults>
</compile_context>

<pallas_src>
import functools

import jax
import jax.numpy as jnp
from jax.experimental import pallas as pl
from jax.experimental.pallas import tpu as pltpu


def _round_up(x, m):
    return ((x + m - 1) // m) * m


def _lstm_kernel(x_ref, wih_ref, whh_ref, b_ref, h0_ref, c0_ref,
                 out_ref, hn_ref, cn_ref,
                 h_sc, c_sc, xp_sc,
                 *, seq_len, t_blk, needs_mask):
    """One grid step == T_BLK timesteps of the LSTM recurrence.

    x_ref   : (T_blk, Bp, Ip)     inputs for this time block (padded)
    wih_ref : (Ip, 4*Hp)          input->gates weights (pre-transposed, gate-block padded)
    whh_ref : (Hp, 4*Hp)          hidden->gates weights (pre-transposed, gate-block padded)
    b_ref   : (1, 4*Hp)           combined bias (b_ih + b_hh), gate-block padded
    h0/c0   : (Bp, Hp)            initial state (padded)
    out_ref : (T_blk, Bp, Hp)     per-step hidden states for this block
    hn/cn   : (Bp, Hp)            final state (resident output, written on last step only)
    h_sc/c_sc : VMEM f32 scratch carrying the recurrent state across grid steps
    xp_sc   : VMEM f32 scratch holding the hoisted input projection for the block
    """
    blk = pl.program_id(0)

    @pl.when(blk == 0)
    def _():
        h_sc[...] = h0_ref[...].astype(jnp.float32)
        c_sc[...] = c0_ref[...].astype(jnp.float32)

    Bp, Hp = h_sc.shape

    # ---- hoisted input projection + bias for the whole time block: one MXU GEMM
    x_blk = x_ref[...].astype(jnp.float32).reshape(t_blk * Bp, -1)
    xp_sc[...] = (
        jnp.dot(x_blk, wih_ref[...], preferred_element_type=jnp.float32)
        + b_ref[...]
    ).reshape(t_blk, Bp, 4 * Hp)

    whh = whh_ref[...]  # resident recurrent weights (Hp, 4*Hp)

    # ---- serial recurrence: only h @ W_hh + gate nonlinearities per step
    h = h_sc[...]
    c = c_sc[...]
    for i in range(t_blk):  # static unroll (t_blk is small and static)
        gates = xp_sc[i] + jnp.dot(h, whh, preferred_element_type=jnp.float32)
        i_g = jax.nn.sigmoid(gates[:, 0 * Hp:1 * Hp])
        f_g = jax.nn.sigmoid(gates[:, 1 * Hp:2 * Hp])
        g_g = jnp.tanh(gates[:, 2 * Hp:3 * Hp])
        o_g = jax.nn.sigmoid(gates[:, 3 * Hp:4 * Hp])
        c_new = f_g * c + i_g * g_g
        h_new = o_g * jnp.tanh(c_new)
        if needs_mask:
            # padded timesteps (global t >= seq_len) must not advance the state
            valid = (blk * t_blk + i) < seq_len
            h_new = jnp.where(valid, h_new, h)
            c_new = jnp.where(valid, c_new, c)
        out_ref[i] = h_new.astype(out_ref.dtype)
        h, c = h_new, c_new

    h_sc[...] = h
    c_sc[...] = c

    # final-state writeback only once, on the last grid step
    @pl.when(blk == pl.num_programs(0) - 1)
    def _():
        hn_ref[...] = h.astype(hn_ref.dtype)
        cn_ref[...] = c.astype(cn_ref.dtype)


def lstm_encoder_forward(x, hidden_state, params, *, t_blk_target=32):
    """Forward pass of LSTMEncoder.

    x            : [batch, seq, input_size]   (batch_first=True)
    hidden_state : (h0, c0) each [num_layers=1, batch, hidden]
    params       : dict with w_ih (4H, I), w_hh (4H, H), b_ih (4H,), b_hh (4H,)

    Returns (lstm_out [batch, seq, hidden], (h_n, c_n) each [1, batch, hidden]).
    """
    h0, c0 = hidden_state
    B, S, I = x.shape
    H = params["w_hh"].shape[1]
    dtype = x.dtype

    # ---- padded, lane-aligned layout
    Bp = _round_up(B, 8)          # >= 8 sublanes
    Hp = _round_up(H, 128)        # each gate block is a multiple of 128 lanes
    Ip = _round_up(I, 8)
    t_blk = max(1, min(t_blk_target, S))
    Sp = _round_up(S, t_blk)
    n_blk = Sp // t_blk
    needs_mask = (Sp != S)

    f32 = jnp.float32

    # Re-pack weights/bias so gate k lives in columns [k*Hp, k*Hp + H) (zero padded).
    wih = params["w_ih"].astype(f32).reshape(4, H, I)
    whh = params["w_hh"].astype(f32).reshape(4, H, H)
    b = (params["b_ih"] + params["b_hh"]).astype(f32).reshape(4, H)

    wih_p = jnp.zeros((4, Hp, Ip), f32).at[:, :H, :I].set(wih)
    whh_p = jnp.zeros((4, Hp, Hp), f32).at[:, :H, :H].set(whh)
    b_p = jnp.zeros((4, Hp), f32).at[:, :H].set(b)

    wih_t = jnp.transpose(wih_p, (2, 0, 1)).reshape(Ip, 4 * Hp)   # (Ip, 4Hp)
    whh_t = jnp.transpose(whh_p, (2, 0, 1)).reshape(Hp, 4 * Hp)   # (Hp, 4Hp)
    bias = b_p.reshape(1, 4 * Hp)

    # time-major, padded inputs / initial state
    x_tm = jnp.transpose(x, (1, 0, 2))                            # [S, B, I]
    x_p = jnp.zeros((Sp, Bp, Ip), dtype).at[:S, :B, :I].set(x_tm)
    h0_p = jnp.zeros((Bp, Hp), f32).at[:B, :H].set(h0[0].astype(f32))
    c0_p = jnp.zeros((Bp, Hp), f32).at[:B, :H].set(c0[0].astype(f32))

    kernel = functools.partial(
        _lstm_kernel, seq_len=S, t_blk=t_blk, needs_mask=needs_mask)

    grid_spec = pltpu.PrefetchScalarGridSpec(
        num_scalar_prefetch=0,
        grid=(n_blk,),
        in_specs=[
            pl.BlockSpec((t_blk, Bp, Ip), lambda b: (b, 0, 0)),   # x block
            pl.BlockSpec((Ip, 4 * Hp), lambda b: (0, 0)),         # W_ih^T (resident)
            pl.BlockSpec((Hp, 4 * Hp), lambda b: (0, 0)),         # W_hh^T (resident)
            pl.BlockSpec((1, 4 * Hp), lambda b: (0, 0)),          # bias   (resident)
            pl.BlockSpec((Bp, Hp), lambda b: (0, 0)),             # h0     (resident)
            pl.BlockSpec((Bp, Hp), lambda b: (0, 0)),             # c0     (resident)
        ],
        out_specs=[
            pl.BlockSpec((t_blk, Bp, Hp), lambda b: (b, 0, 0)),   # hidden states
            pl.BlockSpec((Bp, Hp), lambda b: (0, 0)),             # h_n (resident)
            pl.BlockSpec((Bp, Hp), lambda b: (0, 0)),             # c_n (resident)
        ],
        scratch_shapes=[
            pltpu.VMEM((Bp, Hp), jnp.float32),               # h carry
            pltpu.VMEM((Bp, Hp), jnp.float32),               # c carry
            pltpu.VMEM((t_blk, Bp, 4 * Hp), jnp.float32),    # hoisted input projection
        ],
    )

    out_p, hn_p, cn_p = pl.pallas_call(
        kernel,
        grid_spec=grid_spec,
        out_shape=(
            jax.ShapeDtypeStruct((Sp, Bp, Hp), dtype),
            jax.ShapeDtypeStruct((Bp, Hp), dtype),
            jax.ShapeDtypeStruct((Bp, Hp), dtype),
        ),
        compiler_params=pltpu.CompilerParams(
            dimension_semantics=("arbitrary",)),   # recurrence => sequential grid
    )(x_p, wih_t, whh_t, bias, h0_p, c0_p)

    lstm_out = jnp.transpose(out_p[:S, :B, :H], (1, 0, 2))        # [B, S, H]
    h_n = hn_p[:B, :H][None]
    c_n = cn_p[:B, :H][None]
    return lstm_out, (h_n, c_n)


def init_params(key, input_size, hidden_size):
    """Deterministic synthetic init matching nn.LSTM parameter shapes (layer 0)."""
    k = 1.0 / jnp.sqrt(hidden_size)
    keys = jax.random.split(key, 6)
    params = {
        "w_ih": jax.random.uniform(keys[0], (4 * hidden_size, input_size),
                                   jnp.float32, -k, k),
        "w_hh": jax.random.uniform(keys[1], (4 * hidden_size, hidden_size),
                                   jnp.float32, -k, k),
        "b_ih": jax.random.uniform(keys[2], (4 * hidden_size,), jnp.float32, -k, k),
        "b_hh": jax.random.uniform(keys[3], (4 * hidden_size,), jnp.float32, -k, k),
        # unused in forward(), kept for shape fidelity with the module
        "linear_w": jax.random.uniform(keys[4], (1, 1), jnp.float32, -1.0, 1.0),
        "linear_b": jax.random.uniform(keys[5], (1,), jnp.float32, -1.0, 1.0),
    }
    return params


def _reference_lstm(x, h0, c0, params):
    """Pure-JAX reference (PyTorch nn.LSTM semantics) for sanity checking."""
    H = params["w_hh"].shape[1]
    wih_t = params["w_ih"].T
    whh_t = params["w_hh"].T
    b = params["b_ih"] + params["b_hh"]

    def step(carry, x_t):
        h, c = carry
        gates = x_t @ wih_t + h @ whh_t + b
        i = jax.nn.sigmoid(gates[:, 0 * H:1 * H])
        f = jax.nn.sigmoid(gates[:, 1 * H:2 * H])
        g = jnp.tanh(gates[:, 2 * H:3 * H])
        o = jax.nn.sigmoid(gates[:, 3 * H:4 * H])
        c_new = f * c + i * g
        h_new = o * jnp.tanh(c_new)
        return (h_new, c_new), h_new

    (h_n, c_n), outs = jax.lax.scan(step, (h0[0], c0[0]),
                                    jnp.transpose(x, (1, 0, 2)))
    return jnp.transpose(outs, (1, 0, 2)), (h_n[None], c_n[None])


if __name__ == "__main__":
    INPUT_SIZE = 4
    HIDDEN_SIZE = 32
    NUM_LAYERS = 1
    BATCH = 2
    SEQ = 8

    key = jax.random.PRNGKey(0)
    k_x, k_p = jax.random.split(key)

    x = jax.random.normal(k_x, (BATCH, SEQ, INPUT_SIZE), jnp.float32)
    params = init_params(k_p, INPUT_SIZE, HIDDEN_SIZE)

    # init_hidden(batch_size): zeroed (h0, c0), shape [num_layers, batch, hidden]
    h0 = jnp.zeros((NUM_LAYERS, BATCH, HIDDEN_SIZE), jnp.float32)
    c0 = jnp.zeros((NUM_LAYERS, BATCH, HIDDEN_SIZE), jnp.float32)

    lstm_out, (h_n, c_n) = lstm_encoder_forward(x, (h0, c0), params)
    jax.block_until_ready((lstm_out, h_n, c_n))

    # correctness check vs pure-JAX reference
    ref_out, (ref_h, ref_c) = _reference_lstm(x, h0, c0, params)
    assert lstm_out.shape == (BATCH, SEQ, HIDDEN_SIZE)
    assert h_n.shape == (NUM_LAYERS, BATCH, HIDDEN_SIZE)
    assert c_n.shape == (NUM_LAYERS, BATCH, HIDDEN_SIZE)
    assert jnp.allclose(lstm_out, ref_out, atol=1e-5, rtol=1e-5)
    assert jnp.allclose(h_n, ref_h, atol=1e-5, rtol=1e-5)
    assert jnp.allclose(c_n, ref_c, atol=1e-5, rtol=1e-5)

    print("KERNEL_OK")
</pallas_src>

<mosaic_0001>
module attributes {stable_mosaic.version = 11 : i64} {
  func.func @_lstm_kernel(%arg0: i32, %arg1: memref<8x8x8xf32, #tpu.memory_space<vmem>>, %arg2: memref<8x512xf32, #tpu.memory_space<vmem>>, %arg3: memref<128x512xf32, #tpu.memory_space<vmem>>, %arg4: memref<1x512xf32, #tpu.memory_space<vmem>>, %arg5: memref<8x128xf32, #tpu.memory_space<vmem>>, %arg6: memref<8x128xf32, #tpu.memory_space<vmem>>, %arg7: memref<8x8x128xf32, #tpu.memory_space<vmem>>, %arg8: memref<8x128xf32, #tpu.memory_space<vmem>>, %arg9: memref<8x128xf32, #tpu.memory_space<vmem>>, %arg10: memref<8x128xf32, #tpu.memory_space<vmem>>, %arg11: memref<8x128xf32, #tpu.memory_space<vmem>>, %arg12: memref<8x8x512xf32, #tpu.memory_space<vmem>>) attributes {dimension_semantics = [#tpu.dimension_semantics<arbitrary>], iteration_bounds = array<i64: 1>, scalar_prefetch = 0 : i64, scratch_operands = 3 : i64, tpu.core_type = #tpu.core_type<tc>, window_params = [{transform_indices = @transform_0, window_bounds = array<i64: 8, 8, 8>}, {pipeline_mode = #tpu.pipeline_mode<synchronous>, transform_indices = @transform_1, window_bounds = array<i64: 8, 512>}, {pipeline_mode = #tpu.pipeline_mode<synchronous>, transform_indices = @transform_2, window_bounds = array<i64: 128, 512>}, {pipeline_mode = #tpu.pipeline_mode<synchronous>, transform_indices = @transform_3, window_bounds = array<i64: 1, 512>}, {pipeline_mode = #tpu.pipeline_mode<synchronous>, transform_indices = @transform_4, window_bounds = array<i64: 8, 128>}, {pipeline_mode = #tpu.pipeline_mode<synchronous>, transform_indices = @transform_5, window_bounds = array<i64: 8, 128>}, {transform_indices = @transform_6, window_bounds = array<i64: 8, 8, 128>}, {pipeline_mode = #tpu.pipeline_mode<synchronous>, transform_indices = @transform_7, window_bounds = array<i64: 8, 128>}, {pipeline_mode = #tpu.pipeline_mode<synchronous>, transform_indices = @transform_8, window_bounds = array<i64: 8, 128>}]} {
    %c0_i32 = arith.constant 0 : i32
    %0 = arith.cmpi eq, %arg0, %c0_i32 : i32
    %1 = arith.extui %0 : i1 to i32
    %c0_i32_0 = arith.constant 0 : i32
    %2 = arith.cmpi ne, %1, %c0_i32_0 : i32
    scf.if %2 {
      %c0_95 = arith.constant 0 : index
      %c0_96 = arith.constant 0 : index
      %276 = vector.load %arg5[%c0_95, %c0_96] : memref<8x128xf32, #tpu.memory_space<vmem>>, vector<8x128xf32>
      %c0_97 = arith.constant 0 : index
      %c0_98 = arith.constant 0 : index
      %277 = vector.load %arg10[%c0_97, %c0_98] : memref<8x128xf32, #tpu.memory_space<vmem>>, vector<8x128xf32>
      tpu.vector_store %arg10[%c0_97, %c0_98], %276 {strides = array<i32>} : memref<8x128xf32, #tpu.memory_space<vmem>>, vector<8x128xf32>,
      %c0_99 = arith.constant 0 : index
      %c0_100 = arith.constant 0 : index
      %278 = vector.load %arg6[%c0_99, %c0_100] : memref<8x128xf32, #tpu.memory_space<vmem>>, vector<8x128xf32>
      %c0_101 = arith.constant 0 : index
      %c0_102 = arith.constant 0 : index
      %279 = vector.load %arg11[%c0_101, %c0_102] : memref<8x128xf32, #tpu.memory_space<vmem>>, vector<8x128xf32>
      tpu.vector_store %arg11[%c0_101, %c0_102], %278 {strides = array<i32>} : memref<8x128xf32, #tpu.memory_space<vmem>>, vector<8x128xf32>,
    } else {
    }
    %c0 = arith.constant 0 : index
    %c0_1 = arith.constant 0 : index
    %c0_2 = arith.constant 0 : index
    %3 = vector.load %arg1[%c0, %c0_1, %c0_2] : memref<8x8x8xf32, #tpu.memory_space<vmem>>, vector<8x8x8xf32>
    %4 = vector.shape_cast %3 : vector<8x8x8xf32> to vector<64x8xf32>
    %c0_3 = arith.constant 0 : index
    %c0_4 = arith.constant 0 : index
    %5 = vector.load %arg2[%c0_3, %c0_4] : memref<8x512xf32, #tpu.memory_space<vmem>>, vector<8x512xf32>
    %cst = arith.constant dense<0.000000e+00> : vector<64x512xf32>
    %6 = tpu.matmul %4, %5, %cst {dimension_numbers = #tpu.dot_dimension_numbers<[1], [0], [0], [1], [0, 0, 1, 1], [], []>} : vector<64x8xf32>, vector<8x512xf32>, vector<64x512xf32> -> vector<64x512xf32>
    %c0_5 = arith.constant 0 : index
    %c0_6 = arith.constant 0 : index
    %7 = vector.load %arg4[%c0_5, %c0_6] : memref<1x512xf32, #tpu.memory_space<vmem>>, vector<1x512xf32>
    %8 = vector.broadcast %7 : vector<1x512xf32> to vector<64x512xf32>
    %9 = arith.addf %6, %8 : vector<64x512xf32>
    %10 = vector.shape_cast %9 : vector<64x512xf32> to vector<8x8x512xf32>
    %c0_7 = arith.constant 0 : index
    %c0_8 = arith.constant 0 : index
    %c0_9 = arith.constant 0 : index
    %11 = vector.load %arg12[%c0_7, %c0_8, %c0_9] : memref<8x8x512xf32, #tpu.memory_space<vmem>>, vector<8x8x512xf32>
    tpu.vector_store %arg12[%c0_7, %c0_8, %c0_9], %10 {strides = array<i32>} : memref<8x8x512xf32, #tpu.memory_space<vmem>>, vector<8x8x512xf32>,
    %c0_10 = arith.constant 0 : index
    %c0_11 = arith.constant 0 : index
    %12 = vector.load %arg3[%c0_10, %c0_11] : memref<128x512xf32, #tpu.memory_space<vmem>>, vector<128x512xf32>
    %c0_12 = arith.constant 0 : index
    %c0_13 = arith.constant 0 : index
    %13 = vector.load %arg10[%c0_12, %c0_13] : memref<8x128xf32, #tpu.memory_space<vmem>>, vector<8x128xf32>
    %c0_14 = arith.constant 0 : index
    %c0_15 = arith.constant 0 : index
    %14 = vector.load %arg11[%c0_14, %c0_15] : memref<8x128xf32, #tpu.memory_space<vmem>>, vector<8x128xf32>
    %c0_16 = arith.constant 0 : index
    %c0_17 = arith.constant 0 : index
    %c0_18 = arith.constant 0 : index
    %15 = vector.load %arg12[%c0_16, %c0_17, %c0_18] : memref<8x8x512xf32, #tpu.memory_space<vmem>>, vector<1x8x512xf32>
    %16 = vector.shape_cast %15 : vector<1x8x512xf32> to vector<8x512xf32>
    %cst_19 = arith.constant dense<0.000000e+00> : vector<8x512xf32>
    %17 = tpu.matmul %13, %12, %cst_19 {dimension_numbers = #tpu.dot_dimension_numbers<[1], [0], [0], [1], [0, 0, 1, 1], [], []>} : vector<8x128xf32>, vector<128x512xf32>, vector<8x512xf32> -> vector<8x512xf32>
    %18 = arith.addf %16, %17 : vector<8x512xf32>
    %19 = vector.extract_strided_slice %18 {offsets = [0, 0], sizes = [8, 128], strides = [1, 1]} : vector<8x512xf32> to vector<8x128xf32>
    %20 = arith.negf %19 : vector<8x128xf32>
    %21 = math.exp %20 : vector<8x128xf32>
    %cst_20 = arith.constant 1.000000e+00 : f32
    %22 = vector.broadcast %cst_20 : f32 to vector<8x128xf32>
    %23 = arith.addf %22, %21 : vector<8x128xf32>
    %24 = arith.divf %22, %23 : vector<8x128xf32>
    %25 = vector.extract_strided_slice %18 {offsets = [0, 128], sizes = [8, 128], strides = [1, 1]} : vector<8x512xf32> to vector<8x128xf32>
    %26 = arith.negf %25 : vector<8x128xf32>
    %27 = math.exp %26 : vector<8x128xf32>
    %cst_21 = arith.constant 1.000000e+00 : f32
    %28 = vector.broadcast %cst_21 : f32 to vector<8x128xf32>
    %29 = arith.addf %28, %27 : vector<8x128xf32>
    %30 = arith.divf %28, %29 : vector<8x128xf32>
    %31 = vector.extract_strided_slice %18 {offsets = [0, 256], sizes = [8, 128], strides = [1, 1]} : vector<8x512xf32> to vector<8x128xf32>
    %32 = math.tanh %31 : vector<8x128xf32>
    %33 = vector.extract_strided_slice %18 {offsets = [0, 384], sizes = [8, 128], strides = [1, 1]} : vector<8x512xf32> to vector<8x128xf32>
    %34 = arith.negf %33 : vector<8x128xf32>
    %35 = math.exp %34 : vector<8x128xf32>
    %cst_22 = arith.constant 1.000000e+00 : f32
    %36 = vector.broadcast %cst_22 : f32 to vector<8x128xf32>
    %37 = arith.addf %36, %35 : vector<8x128xf32>
    %38 = arith.divf %36, %37 : vector<8x128xf32>
    %39 = arith.mulf %30, %14 : vector<8x128xf32>
    %40 = arith.mulf %24, %32 : vector<8x128xf32>
    %41 = arith.addf %39, %40 : vector<8x128xf32>
    %42 = math.tanh %41 : vector<8x128xf32>
    %43 = arith.mulf %38, %42 : vector<8x128xf32>
    %c0_23 = arith.constant 0 : index
    %c0_24 = arith.constant 0 : index
    %c0_25 = arith.constant 0 : index
    %44 = vector.load %arg7[%c0_23, %c0_24, %c0_25] : memref<8x8x128xf32, #tpu.memory_space<vmem>>, vector<1x8x128xf32>
    %45 = vector.shape_cast %44 : vector<1x8x128xf32> to vector<8x128xf32>
    %46 = vector.shape_cast %43 : vector<8x128xf32> to vector<1x8x128xf32>
    tpu.vector_store %arg7[%c0_23, %c0_24, %c0_25], %46 {strides = array<i32>} : memref<8x8x128xf32, #tpu.memory_space<vmem>>, vector<1x8x128xf32>,
    %c1 = arith.constant 1 : index
    %c0_26 = arith.constant 0 : index
    %c0_27 = arith.constant 0 : index
    %47 = vector.load %arg12[%c1, %c0_26, %c0_27] : memref<8x8x512xf32, #tpu.memory_space<vmem>>, vector<1x8x512xf32>
    %48 = vector.shape_cast %47 : vector<1x8x512xf32> to vector<8x512xf32>
    %cst_28 = arith.constant dense<0.000000e+00> : vector<8x512xf32>
    %49 = tpu.matmul %43, %12, %cst_28 {dimension_numbers = #tpu.dot_dimension_numbers<[1], [0], [0], [1], [0, 0, 1, 1], [], []>} : vector<8x128xf32>, vector<128x512xf32>, vector<8x512xf32> -> vector<8x512xf32>
    %50 = arith.addf %48, %49 : vector<8x512xf32>
    %51 = vector.extract_strided_slice %50 {offsets = [0, 0], sizes = [8, 128], strides = [1, 1]} : vector<8x512xf32> to vector<8x128xf32>
    %52 = arith.negf %51 : vector<8x128xf32>
    %53 = math.exp %52 : vector<8x128xf32>
    %cst_29 = arith.constant 1.000000e+00 : f32
    %54 = vector.broadcast %cst_29 : f32 to vector<8x128xf32>
    %55 = arith.addf %54, %53 : vector<8x128xf32>
    %56 = arith.divf %54, %55 : vector<8x128xf32>
    %57 = vector.extract_strided_slice %50 {offsets = [0, 128], sizes = [8, 128], strides = [1, 1]} : vector<8x512xf32> to vector<8x128xf32>
    %58 = arith.negf %57 : vector<8x128xf32>
    %59 = math.exp %58 : vector<8x128xf32>
    %cst_30 = arith.constant 1.000000e+00 : f32
    %60 = vector.broadcast %cst_30 : f32 to vector<8x128xf32>
    %61 = arith.addf %60, %59 : vector<8x128xf32>
    %62 = arith.divf %60, %61 : vector<8x128xf32>
    %63 = vector.extract_strided_slice %50 {offsets = [0, 256], sizes = [8, 128], strides = [1, 1]} : vector<8x512xf32> to vector<8x128xf32>
    %64 = math.tanh %63 : vector<8x128xf32>
    %65 = vector.extract_strided_slice %50 {offsets = [0, 384], sizes = [8, 128], strides = [1, 1]} : vector<8x512xf32> to vector<8x128xf32>
    %66 = arith.negf %65 : vector<8x128xf32>
    %67 = math.exp %66 : vector<8x128xf32>
    %cst_31 = arith.constant 1.000000e+00 : f32
    %68 = vector.broadcast %cst_31 : f32 to vector<8x128xf32>
    %69 = arith.addf %68, %67 : vector<8x128xf32>
    %70 = arith.divf %68, %69 : vector<8x128xf32>
    %71 = arith.mulf %62, %41 : vector<8x128xf32>
    %72 = arith.mulf %56, %64 : vector<8x128xf32>
    %73 = arith.addf %71, %72 : vector<8x128xf32>
    %74 = math.tanh %73 : vector<8x128xf32>
    %75 = arith.mulf %70, %74 : vector<8x128xf32>
    %c1_32 = arith.constant 1 : index
    %c0_33 = arith.constant 0 : index
    %c0_34 = arith.constant 0 : index
    %76 = vector.load %arg7[%c1_32, %c0_33, %c0_34] : memref<8x8x128xf32, #tpu.memory_space<vmem>>, vector<1x8x128xf32>
    %77 = vector.shape_cast %76 : vector<1x8x128xf32> to vector<8x128xf32>
    %78 = vector.shape_cast %75 : vector<8x128xf32> to vector<1x8x128xf32>
    tpu.vector_store %arg7[%c1_32, %c0_33, %c0_34], %78 {strides = array<i32>} : memref<8x8x128xf32, #tpu.memory_space<vmem>>, vector<1x8x128xf32>,
    %c2 = arith.constant 2 : index
    %c0_35 = arith.constant 0 : index
    %c0_36 = arith.constant 0 : index
    %79 = vector.load %arg12[%c2, %c0_35, %c0_36] : memref<8x8x512xf32, #tpu.memory_space<vmem>>, vector<1x8x512xf32>
    %80 = vector.shape_cast %79 : vector<1x8x512xf32> to vector<8x512xf32>
    %cst_37 = arith.constant dense<0.000000e+00> : vector<8x512xf32>
    %81 = tpu.matmul %75, %12, %cst_37 {dimension_numbers = #tpu.dot_dimension_numbers<[1], [0], [0], [1], [0, 0, 1, 1], [], []>} : vector<8x128xf32>, vector<128x512xf32>, vector<8x512xf32> -> vector<8x512xf32>
    %82 = arith.addf %80, %81 : vector<8x512xf32>
    %83 = vector.extract_strided_slice %82 {offsets = [0, 0], sizes = [8, 128], strides = [1, 1]} : vector<8x512xf32> to vector<8x128xf32>
    %84 = arith.negf %83 : vector<8x128xf32>
    %85 = math.exp %84 : vector<8x128xf32>
    %cst_38 = arith.constant 1.000000e+00 : f32
    %86 = vector.broadcast %cst_38 : f32 to vector<8x128xf32>
    %87 = arith.addf %86, %85 : vector<8x128xf32>
    %88 = arith.divf %86, %87 : vector<8x128xf32>
    %89 = vector.extract_strided_slice %82 {offsets = [0, 128], sizes = [8, 128], strides = [1, 1]} : vector<8x512xf32> to vector<8x128xf32>
    %90 = arith.negf %89 : vector<8x128xf32>
    %91 = math.exp %90 : vector<8x128xf32>
    %cst_39 = arith.constant 1.000000e+00 : f32
    %92 = vector.broadcast %cst_39 : f32 to vector<8x128xf32>
    %93 = arith.addf %92, %91 : vector<8x128xf32>
    %94 = arith.divf %92, %93 : vector<8x128xf32>
    %95 = vector.extract_strided_slice %82 {offsets = [0, 256], sizes = [8, 128], strides = [1, 1]} : vector<8x512xf32> to vector<8x128xf32>
    %96 = math.tanh %95 : vector<8x128xf32>
    %97 = vector.extract_strided_slice %82 {offsets = [0, 384], sizes = [8, 128], strides = [1, 1]} : vector<8x512xf32> to vector<8x128xf32>
    %98 = arith.negf %97 : vector<8x128xf32>
    %99 = math.exp %98 : vector<8x128xf32>
    %cst_40 = arith.constant 1.000000e+00 : f32
    %100 = vector.broadcast %cst_40 : f32 to vector<8x128xf32>
    %101 = arith.addf %100, %99 : vector<8x128xf32>
    %102 = arith.divf %100, %101 : vector<8x128xf32>
    %103 = arith.mulf %94, %73 : vector<8x128xf32>
    %104 = arith.mulf %88, %96 : vector<8x128xf32>
    %105 = arith.addf %103, %104 : vector<8x128xf32>
    %106 = math.tanh %105 : vector<8x128xf32>
    %107 = arith.mulf %102, %106 : vector<8x128xf32>
    %c2_41 = arith.constant 2 : index
    %c0_42 = arith.constant 0 : index
    %c0_43 = arith.constant 0 : index
    %108 = vector.load %arg7[%c2_41, %c0_42, %c0_43] : memref<8x8x128xf32, #tpu.memory_space<vmem>>, vector<1x8x128xf32>
    %109 = vector.shape_cast %108 : vector<1x8x128xf32> to vector<8x128xf32>
    %110 = vector.shape_cast %107 : vector<8x128xf32> to vector<1x8x128xf32>
    tpu.vector_store %arg7[%c2_41, %c0_42, %c0_43], %110 {strides = array<i32>} : memref<8x8x128xf32, #tpu.memory_space<vmem>>, vector<1x8x128xf32>,
    %c3 = arith.constant 3 : index
    %c0_44 = arith.constant 0 : index
    %c0_45 = arith.constant 0 : index
    %111 = vector.load %arg12[%c3, %c0_44, %c0_45] : memref<8x8x512xf32, #tpu.memory_space<vmem>>, vector<1x8x512xf32>
    %112 = vector.shape_cast %111 : vector<1x8x512xf32> to vector<8x512xf32>
    %cst_46 = arith.constant dense<0.000000e+00> : vector<8x512xf32>
    %113 = tpu.matmul %107, %12, %cst_46 {dimension_numbers = #tpu.dot_dimension_numbers<[1], [0], [0], [1], [0, 0, 1, 1], [], []>} : vector<8x128xf32>, vector<128x512xf32>, vector<8x512xf32> -> vector<8x512xf32>
    %114 = arith.addf %112, %113 : vector<8x512xf32>
    %115 = vector.extract_strided_slice %114 {offsets = [0, 0], sizes = [8, 128], strides = [1, 1]} : vector<8x512xf32> to vector<8x128xf32>
    %116 = arith.negf %115 : vector<8x128xf32>
    %117 = math.exp %116 : vector<8x128xf32>
    %cst_47 = arith.constant 1.000000e+00 : f32
    %118 = vector.broadcast %cst_47 : f32 to vector<8x128xf32>
    %119 = arith.addf %118, %117 : vector<8x128xf32>
    %120 = arith.divf %118, %119 : vector<8x128xf32>
    %121 = vector.extract_strided_slice %114 {offsets = [0, 128], sizes = [8, 128], strides = [1, 1]} : vector<8x512xf32> to vector<8x128xf32>
    %122 = arith.negf %121 : vector<8x128xf32>
    %123 = math.exp %122 : vector<8x128xf32>
    %cst_48 = arith.constant 1.000000e+00 : f32
    %124 = vector.broadcast %cst_48 : f32 to vector<8x128xf32>
    %125 = arith.addf %124, %123 : vector<8x128xf32>
    %126 = arith.divf %124, %125 : vector<8x128xf32>
    %127 = vector.extract_strided_slice %114 {offsets = [0, 256], sizes = [8, 128], strides = [1, 1]} : vector<8x512xf32> to vector<8x128xf32>
    %128 = math.tanh %127 : vector<8x128xf32>
    %129 = vector.extract_strided_slice %114 {offsets = [0, 384], sizes = [8, 128], strides = [1, 1]} : vector<8x512xf32> to vector<8x128xf32>
    %130 = arith.negf %129 : vector<8x128xf32>
    %131 = math.exp %130 : vector<8x128xf32>
    %cst_49 = arith.constant 1.000000e+00 : f32
    %132 = vector.broadcast %cst_49 : f32 to vector<8x128xf32>
    %133 = arith.addf %132, %131 : vector<8x128xf32>
    %134 = arith.divf %132, %133 : vector<8x128xf32>
    %135 = arith.mulf %126, %105 : vector<8x128xf32>
    %136 = arith.mulf %120, %128 : vector<8x128xf32>
    %137 = arith.addf %135, %136 : vector<8x128xf32>
    %138 = math.tanh %137 : vector<8x128xf32>
    %139 = arith.mulf %134, %138 : vector<8x128xf32>
    %c3_50 = arith.constant 3 : index
    %c0_51 = arith.constant 0 : index
    %c0_52 = arith.constant 0 : index
    %140 = vector.load %arg7[%c3_50, %c0_51, %c0_52] : memref<8x8x128xf32, #tpu.memory_space<vmem>>, vector<1x8x128xf32>
    %141 = vector.shape_cast %140 : vector<1x8x128xf32> to vector<8x128xf32>
    %142 = vector.shape_cast %139 : vector<8x128xf32> to vector<1x8x128xf32>
    tpu.vector_store %arg7[%c3_50, %c0_51, %c0_52], %142 {strides = array<i32>} : memref<8x8x128xf32, #tpu.memory_space<vmem>>, vector<1x8x128xf32>,
    %c4 = arith.constant 4 : index
    %c0_53 = arith.constant 0 : index
    %c0_54 = arith.constant 0 : index
    %143 = vector.load %arg12[%c4, %c0_53, %c0_54] : memref<8x8x512xf32, #tpu.memory_space<vmem>>, vector<1x8x512xf32>
    %144 = vector.shape_cast %143 : vector<1x8x512xf32> to vector<8x512xf32>
    %cst_55 = arith.constant dense<0.000000e+00> : vector<8x512xf32>
    %145 = tpu.matmul %139, %12, %cst_55 {dimension_numbers = #tpu.dot_dimension_numbers<[1], [0], [0], [1], [0, 0, 1, 1], [], []>} : vector<8x128xf32>, vector<128x512xf32>, vector<8x512xf32> -> vector<8x512xf32>
    %146 = arith.addf %144, %145 : vector<8x512xf32>
    %147 = vector.extract_strided_slice %146 {offsets = [0, 0], sizes = [8, 128], strides = [1, 1]} : vector<8x512xf32> to vector<8x128xf32>
    %148 = arith.negf %147 : vector<8x128xf32>
    %149 = math.exp %148 : vector<8x128xf32>
    %cst_56 = arith.constant 1.000000e+00 : f32
    %150 = vector.broadcast %cst_56 : f32 to vector<8x128xf32>
    %151 = arith.addf %150, %149 : vector<8x128xf32>
    %152 = arith.divf %150, %151 : vector<8x128xf32>
    %153 = vector.extract_strided_slice %146 {offsets = [0, 128], sizes = [8, 128], strides = [1, 1]} : vector<8x512xf32> to vector<8x128xf32>
    %154 = arith.negf %153 : vector<8x128xf32>
    %155 = math.exp %154 : vector<8x128xf32>
    %cst_57 = arith.constant 1.000000e+00 : f32
    %156 = vector.broadcast %cst_57 : f32 to vector<8x128xf32>
    %157 = arith.addf %156, %155 : vector<8x128xf32>
    %158 = arith.divf %156, %157 : vector<8x128xf32>
    %159 = vector.extract_strided_slice %146 {offsets = [0, 256], sizes = [8, 128], strides = [1, 1]} : vector<8x512xf32> to vector<8x128xf32>
    %160 = math.tanh %159 : vector<8x128xf32>
    %161 = vector.extract_strided_slice %146 {offsets = [0, 384], sizes = [8, 128], strides = [1, 1]} : vector<8x512xf32> to vector<8x128xf32>
    %162 = arith.negf %161 : vector<8x128xf32>
    %163 = math.exp %162 : vector<8x128xf32>
    %cst_58 = arith.constant 1.000000e+00 : f32
    %164 = vector.broadcast %cst_58 : f32 to vector<8x128xf32>
    %165 = arith.addf %164, %163 : vector<8x128xf32>
    %166 = arith.divf %164, %165 : vector<8x128xf32>
    %167 = arith.mulf %158, %137 : vector<8x128xf32>
    %168 = arith.mulf %152, %160 : vector<8x128xf32>
    %169 = arith.addf %167, %168 : vector<8x128xf32>
    %170 = math.tanh %169 : vector<8x128xf32>
    %171 = arith.mulf %166, %170 : vector<8x128xf32>
    %c4_59 = arith.constant 4 : index
    %c0_60 = arith.constant 0 : index
    %c0_61 = arith.constant 0 : index
    %172 = vector.load %arg7[%c4_59, %c0_60, %c0_61] : memref<8x8x128xf32, #tpu.memory_space<vmem>>, vector<1x8x128xf32>
    %173 = vector.shape_cast %172 : vector<1x8x128xf32> to vector<8x128xf32>
    %174 = vector.shape_cast %171 : vector<8x128xf32> to vector<1x8x128xf32>
    tpu.vector_store %arg7[%c4_59, %c0_60, %c0_61], %174 {strides = array<i32>} : memref<8x8x128xf32, #tpu.memory_space<vmem>>, vector<1x8x128xf32>,
    %c5 = arith.constant 5 : index
    %c0_62 = arith.constant 0 : index
    %c0_63 = arith.constant 0 : index
    %175 = vector.load %arg12[%c5, %c0_62, %c0_63] : memref<8x8x512xf32, #tpu.memory_space<vmem>>, vector<1x8x512xf32>
    %176 = vector.shape_cast %175 : vector<1x8x512xf32> to vector<8x512xf32>
    %cst_64 = arith.constant dense<0.000000e+00> : vector<8x512xf32>
    %177 = tpu.matmul %171, %12, %cst_64 {dimension_numbers = #tpu.dot_dimension_numbers<[1], [0], [0], [1], [0, 0, 1, 1], [], []>} : vector<8x128xf32>, vector<128x512xf32>, vector<8x512xf32> -> vector<8x512xf32>
    %178 = arith.addf %176, %177 : vector<8x512xf32>
    %179 = vector.extract_strided_slice %178 {offsets = [0, 0], sizes = [8, 128], strides = [1, 1]} : vector<8x512xf32> to vector<8x128xf32>
    %180 = arith.negf %179 : vector<8x128xf32>
    %181 = math.exp %180 : vector<8x128xf32>
    %cst_65 = arith.constant 1.000000e+00 : f32
    %182 = vector.broadcast %cst_65 : f32 to vector<8x128xf32>
    %183 = arith.addf %182, %181 : vector<8x128xf32>
    %184 = arith.divf %182, %183 : vector<8x128xf32>
    %185 = vector.extract_strided_slice %178 {offsets = [0, 128], sizes = [8, 128], strides = [1, 1]} : vector<8x512xf32> to vector<8x128xf32>
    %186 = arith.negf %185 : vector<8x128xf32>
    %187 = math.exp %186 : vector<8x128xf32>
    %cst_66 = arith.constant 1.000000e+00 : f32
    %188 = vector.broadcast %cst_66 : f32 to vector<8x128xf32>
    %189 = arith.addf %188, %187 : vector<8x128xf32>
    %190 = arith.divf %188, %189 : vector<8x128xf32>
    %191 = vector.extract_strided_slice %178 {offsets = [0, 256], sizes = [8, 128], strides = [1, 1]} : vector<8x512xf32> to vector<8x128xf32>
    %192 = math.tanh %191 : vector<8x128xf32>
    %193 = vector.extract_strided_slice %178 {offsets = [0, 384], sizes = [8, 128], strides = [1, 1]} : vector<8x512xf32> to vector<8x128xf32>
    %194 = arith.negf %193 : vector<8x128xf32>
    %195 = math.exp %194 : vector<8x128xf32>
    %cst_67 = arith.constant 1.000000e+00 : f32
    %196 = vector.broadcast %cst_67 : f32 to vector<8x128xf32>
    %197 = arith.addf %196, %195 : vector<8x128xf32>
    %198 = arith.divf %196, %197 : vector<8x128xf32>
    %199 = arith.mulf %190, %169 : vector<8x128xf32>
    %200 = arith.mulf %184, %192 : vector<8x128xf32>
    %201 = arith.addf %199, %200 : vector<8x128xf32>
    %202 = math.tanh %201 : vector<8x128xf32>
    %203 = arith.mulf %198, %202 : vector<8x128xf32>
    %c5_68 = arith.constant 5 : index
    %c0_69 = arith.constant 0 : index
    %c0_70 = arith.constant 0 : index
    %204 = vector.load %arg7[%c5_68, %c0_69, %c0_70] : memref<8x8x128xf32, #tpu.memory_space<vmem>>, vector<1x8x128xf32>
    %205 = vector.shape_cast %204 : vector<1x8x128xf32> to vector<8x128xf32>
    %206 = vector.shape_cast %203 : vector<8x128xf32> to vector<1x8x128xf32>
    tpu.vector_store %arg7[%c5_68, %c0_69, %c0_70], %206 {strides = array<i32>} : memref<8x8x128xf32, #tpu.memory_space<vmem>>, vector<1x8x128xf32>,
    %c6 = arith.constant 6 : index
    %c0_71 = arith.constant 0 : index
    %c0_72 = arith.constant 0 : index
    %207 = vector.load %arg12[%c6, %c0_71, %c0_72] : memref<8x8x512xf32, #tpu.memory_space<vmem>>, vector<1x8x512xf32>
    %208 = vector.shape_cast %207 : vector<1x8x512xf32> to vector<8x512xf32>
    %cst_73 = arith.constant dense<0.000000e+00> : vector<8x512xf32>
    %209 = tpu.matmul %203, %12, %cst_73 {dimension_numbers = #tpu.dot_dimension_numbers<[1], [0], [0], [1], [0, 0, 1, 1], [], []>} : vector<8x128xf32>, vector<128x512xf32>, vector<8x512xf32> -> vector<8x512xf32>
    %210 = arith.addf %208, %209 : vector<8x512xf32>
    %211 = vector.extract_strided_slice %210 {offsets = [0, 0], sizes = [8, 128], strides = [1, 1]} : vector<8x512xf32> to vector<8x128xf32>
    %212 = arith.negf %211 : vector<8x128xf32>
    %213 = math.exp %212 : vector<8x128xf32>
    %cst_74 = arith.constant 1.000000e+00 : f32
    %214 = vector.broadcast %cst_74 : f32 to vector<8x128xf32>
    %215 = arith.addf %214, %213 : vector<8x128xf32>
    %216 = arith.divf %214, %215 : vector<8x128xf32>
    %217 = vector.extract_strided_slice %210 {offsets = [0, 128], sizes = [8, 128], strides = [1, 1]} : vector<8x512xf32> to vector<8x128xf32>
    %218 = arith.negf %217 : vector<8x128xf32>
    %219 = math.exp %218 : vector<8x128xf32>
    %cst_75 = arith.constant 1.000000e+00 : f32
    %220 = vector.broadcast %cst_75 : f32 to vector<8x128xf32>
    %221 = arith.addf %220, %219 : vector<8x128xf32>
    %222 = arith.divf %220, %221 : vector<8x128xf32>
    %223 = vector.extract_strided_slice %210 {offsets = [0, 256], sizes = [8, 128], strides = [1, 1]} : vector<8x512xf32> to vector<8x128xf32>
    %224 = math.tanh %223 : vector<8x128xf32>
    %225 = vector.extract_strided_slice %210 {offsets = [0, 384], sizes = [8, 128], strides = [1, 1]} : vector<8x512xf32> to vector<8x128xf32>
    %226 = arith.negf %225 : vector<8x128xf32>
    %227 = math.exp %226 : vector<8x128xf32>
    %cst_76 = arith.constant 1.000000e+00 : f32
    %228 = vector.broadcast %cst_76 : f32 to vector<8x128xf32>
    %229 = arith.addf %228, %227 : vector<8x128xf32>
    %230 = arith.divf %228, %229 : vector<8x128xf32>
    %231 = arith.mulf %222, %201 : vector<8x128xf32>
    %232 = arith.mulf %216, %224 : vector<8x128xf32>
    %233 = arith.addf %231, %232 : vector<8x128xf32>
    %234 = math.tanh %233 : vector<8x128xf32>
    %235 = arith.mulf %230, %234 : vector<8x128xf32>
    %c6_77 = arith.constant 6 : index
    %c0_78 = arith.constant 0 : index
    %c0_79 = arith.constant 0 : index
    %236 = vector.load %arg7[%c6_77, %c0_78, %c0_79] : memref<8x8x128xf32, #tpu.memory_space<vmem>>, vector<1x8x128xf32>
    %237 = vector.shape_cast %236 : vector<1x8x128xf32> to vector<8x128xf32>
    %238 = vector.shape_cast %235 : vector<8x128xf32> to vector<1x8x128xf32>
    tpu.vector_store %arg7[%c6_77, %c0_78, %c0_79], %238 {strides = array<i32>} : memref<8x8x128xf32, #tpu.memory_space<vmem>>, vector<1x8x128xf32>,
    %c7 = arith.constant 7 : index
    %c0_80 = arith.constant 0 : index
    %c0_81 = arith.constant 0 : index
    %239 = vector.load %arg12[%c7, %c0_80, %c0_81] : memref<8x8x512xf32, #tpu.memory_space<vmem>>, vector<1x8x512xf32>
    %240 = vector.shape_cast %239 : vector<1x8x512xf32> to vector<8x512xf32>
    %cst_82 = arith.constant dense<0.000000e+00> : vector<8x512xf32>
    %241 = tpu.matmul %235, %12, %cst_82 {dimension_numbers = #tpu.dot_dimension_numbers<[1], [0], [0], [1], [0, 0, 1, 1], [], []>} : vector<8x128xf32>, vector<128x512xf32>, vector<8x512xf32> -> vector<8x512xf32>
    %242 = arith.addf %240, %241 : vector<8x512xf32>
    %243 = vector.extract_strided_slice %242 {offsets = [0, 0], sizes = [8, 128], strides = [1, 1]} : vector<8x512xf32> to vector<8x128xf32>
    %244 = arith.negf %243 : vector<8x128xf32>
    %245 = math.exp %244 : vector<8x128xf32>
    %cst_83 = arith.constant 1.000000e+00 : f32
    %246 = vector.broadcast %cst_83 : f32 to vector<8x128xf32>
    %247 = arith.addf %246, %245 : vector<8x128xf32>
    %248 = arith.divf %246, %247 : vector<8x128xf32>
    %249 = vector.extract_strided_slice %242 {offsets = [0, 128], sizes = [8, 128], strides = [1, 1]} : vector<8x512xf32> to vector<8x128xf32>
    %250 = arith.negf %249 : vector<8x128xf32>
    %251 = math.exp %250 : vector<8x128xf32>
    %cst_84 = arith.constant 1.000000e+00 : f32
    %252 = vector.broadcast %cst_84 : f32 to vector<8x128xf32>
    %253 = arith.addf %252, %251 : vector<8x128xf32>
    %254 = arith.divf %252, %253 : vector<8x128xf32>
    %255 = vector.extract_strided_slice %242 {offsets = [0, 256], sizes = [8, 128], strides = [1, 1]} : vector<8x512xf32> to vector<8x128xf32>
    %256 = math.tanh %255 : vector<8x128xf32>
    %257 = vector.extract_strided_slice %242 {offsets = [0, 384], sizes = [8, 128], strides = [1, 1]} : vector<8x512xf32> to vector<8x128xf32>
    %258 = arith.negf %257 : vector<8x128xf32>
    %259 = math.exp %258 : vector<8x128xf32>
    %cst_85 = arith.constant 1.000000e+00 : f32
    %260 = vector.broadcast %cst_85 : f32 to vector<8x128xf32>
    %261 = arith.addf %260, %259 : vector<8x128xf32>
    %262 = arith.divf %260, %261 : vector<8x128xf32>
    %263 = arith.mulf %254, %233 : vector<8x128xf32>
    %264 = arith.mulf %248, %256 : vector<8x128xf32>
    %265 = arith.addf %263, %264 : vector<8x128xf32>
    %266 = math.tanh %265 : vector<8x128xf32>
    %267 = arith.mulf %262, %266 : vector<8x128xf32>
    %c7_86 = arith.constant 7 : index
    %c0_87 = arith.constant 0 : index
    %c0_88 = arith.constant 0 : index
    %268 = vector.load %arg7[%c7_86, %c0_87, %c0_88] : memref<8x8x128xf32, #tpu.memory_space<vmem>>, vector<1x8x128xf32>
    %269 = vector.shape_cast %268 : vector<1x8x128xf32> to vector<8x128xf32>
    %270 = vector.shape_cast %267 : vector<8x128xf32> to vector<1x8x128xf32>
    tpu.vector_store %arg7[%c7_86, %c0_87, %c0_88], %270 {strides = array<i32>} : memref<8x8x128xf32, #tpu.memory_space<vmem>>, vector<1x8x128xf32>,
    %c0_89 = arith.constant 0 : index
    %c0_90 = arith.constant 0 : index
    %271 = vector.load %arg10[%c0_89, %c0_90] : memref<8x128xf32, #tpu.memory_space<vmem>>, vector<8x128xf32>
    tpu.vector_store %arg10[%c0_89, %c0_90], %267 {strides = array<i32>} : memref<8x128xf32, #tpu.memory_space<vmem>>, vector<8x128xf32>,
    %c0_91 = arith.constant 0 : index
    %c0_92 = arith.constant 0 : index
    %272 = vector.load %arg11[%c0_91, %c0_92] : memref<8x128xf32, #tpu.memory_space<vmem>>, vector<8x128xf32>
    tpu.vector_store %arg11[%c0_91, %c0_92], %265 {strides = array<i32>} : memref<8x128xf32, #tpu.memory_space<vmem>>, vector<8x128xf32>,
    %c0_i32_93 = arith.constant 0 : i32
    %273 = arith.cmpi eq, %arg0, %c0_i32_93 : i32
    %274 = arith.extui %273 : i1 to i32
    %c0_i32_94 = arith.constant 0 : i32
    %275 = arith.cmpi ne, %274, %c0_i32_94 : i32
    scf.if %275 {
      %c0_95 = arith.constant 0 : index
      %c0_96 = arith.constant 0 : index
      %276 = vector.load %arg8[%c0_95, %c0_96] : memref<8x128xf32, #tpu.memory_space<vmem>>, vector<8x128xf32>
      tpu.vector_store %arg8[%c0_95, %c0_96], %267 {strides = array<i32>} : memref<8x128xf32, #tpu.memory_space<vmem>>, vector<8x128xf32>,
      %c0_97 = arith.constant 0 : index
      %c0_98 = arith.constant 0 : index
      %277 = vector.load %arg9[%c0_97, %c0_98] : memref<8x128xf32, #tpu.memory_space<vmem>>, vector<8x128xf32>
      tpu.vector_store %arg9[%c0_97, %c0_98], %265 {strides = array<i32>} : memref<8x128xf32, #tpu.memory_space<vmem>>, vector<8x128xf32>,
    } else {
    }
    return
  }
  func.func @transform_0(%arg0: i32) -> (i32, i32, i32) {
    %c0_i32 = arith.constant 0 : i32
    %c0_i32_0 = arith.constant 0 : i32
    %c0_i32_1 = arith.constant 0 : i32
    return %arg0, %c0_i32, %c0_i32_0 : i32, i32, i32
  }
  func.func @transform_1(%arg0: i32) -> (i32, i32) {
    %c0_i32 = arith.constant 0 : i32
    %c0_i32_0 = arith.constant 0 : i32
    %c0_i32_1 = arith.constant 0 : i32
    return %c0_i32, %c0_i32_0 : i32, i32
  }
  func.func @transform_2(%arg0: i32) -> (i32, i32) {
    %c0_i32 = arith.constant 0 : i32
    %c0_i32_0 = arith.constant 0 : i32
    %c0_i32_1 = arith.constant 0 : i32
    return %c0_i32, %c0_i32_0 : i32, i32
  }
  func.func @transform_3(%arg0: i32) -> (i32, i32) {
    %c0_i32 = arith.constant 0 : i32
    %c0_i32_0 = arith.constant 0 : i32
    %c0_i32_1 = arith.constant 0 : i32
    return %c0_i32, %c0_i32_0 : i32, i32
  }
  func.func @transform_4(%arg0: i32) -> (i32, i32) {
    %c0_i32 = arith.constant 0 : i32
    %c0_i32_0 = arith.constant 0 : i32
    %c0_i32_1 = arith.constant 0 : i32
    return %c0_i32, %c0_i32_0 : i32, i32
  }
  func.func @transform_5(%arg0: i32) -> (i32, i32) {
    %c0_i32 = arith.constant 0 : i32
    %c0_i32_0 = arith.constant 0 : i32
    %c0_i32_1 = arith.constant 0 : i32
    return %c0_i32, %c0_i32_0 : i32, i32
  }
  func.func @transform_6(%arg0: i32) -> (i32, i32, i32) {
    %c0_i32 = arith.constant 0 : i32
    %c0_i32_0 = arith.constant 0 : i32
    %c0_i32_1 = arith.constant 0 : i32
    return %arg0, %c0_i32, %c0_i32_0 : i32, i32, i32
  }
  func.func @transform_7(%arg0: i32) -> (i32, i32) {
    %c0_i32 = arith.constant 0 : i32
    %c0_i32_0 = arith.constant 0 : i32
    %c0_i32_1 = arith.constant 0 : i32
    return %c0_i32, %c0_i32_0 : i32, i32
  }
  func.func @transform_8(%arg0: i32) -> (i32, i32) {
    %c0_i32 = arith.constant 0 : i32
    %c0_i32_0 = arith.constant 0 : i32
    %c0_i32_1 = arith.constant 0 : i32
    return %c0_i32, %c0_i32_0 : i32, i32
  }
}

</mosaic_0001>

<bundles_post_ra>
// kernel: tpu_custom_call.1
= control target key start
LH: loop header
LB: loop body
LE: loop exit
PB: predicated region body
PF: predicated region fallthrough
CT: control target
= control target key end

     0   :  { %14 = vsyncpa [#allocation6], 0  ;;  %s3463_s0 = inlined_call_operand.hbm [shape: f32[8,8,8], index: 0, kind: input, shape index: {}]   ;;  %s3464_s1 = inlined_call_operand.hbm [shape: f32[8,512], index: 1, kind: input, shape index: {}]   ;;  %s3465_s2 = inlined_call_operand.hbm [shape: f32[128,512], index: 2, kind: input, shape index: {}]   ;;  %s3466_s3 = inlined_call_operand.hbm [shape: f32[1,512], index: 3, kind: input, shape index: {}]   ;;  %s3467_s4 = inlined_call_operand.vmem [shape: f32[8,128], index: 4, kind: input, shape index: {}]   ;;  %s3468_s5 = inlined_call_operand.vmem [shape: f32[8,128], index: 5, kind: input, shape index: {}]   ;;  %s3469_s6 = inlined_call_operand.hbm [shape: f32[8,8,128], index: 6, kind: output, shape index: {0}]   ;;  %s3470_s7 = inlined_call_operand.hbm [shape: f32[8,128], index: 7, kind: output, shape index: {1}]   ;;  %s3471_s8 = inlined_call_operand.hbm [shape: f32[8,128], index: 8, kind: output, shape index: {2}]  }
   0x1   :  { %15 = vsyncpa [#allocation9], 0 }
   0x2   :  { %16 = vsyncpa [#allocation12], 0 }
   0x3   :  { %17 = vsyncpa [#allocation7], 0 }
   0x4   :  { %18 = vsyncpa [#allocation15], 0  ;;  %s2857_s27 = smov [#allocation8]   ;;  %s2858_s29 = smov [#allocation5]  }
   0x5   :  { %s37_s28 = sshll.u32 %s2857_s27, 4  ;;  %s24_s30 = sshll.u32 %s2858_s29, 4  ;;  %s38_s28 = int_to_ptr.vmem [resolvable:$true] %s37_s28  ;;  %s2914_s30 = int_to_ptr.vmem [resolvable:$true] %s24_s30 }
   0x6   :  { %s2693_s11 = scalar_lea.hbm %s3464_s1, 512 }
   0x7   :  { %p2694_p0 = scmp.ne.s32.totalorder %s3464_s1, %s2693_s11  ;;  %p2697_p1 = scmp.lt.u32.totalorder %s2693_s11, %s3464_s1 }
   0x9   :  { %p2699_p2 = pnand %p2697_p1, %p2694_p0 }
   0xb   :  { %2702 = shalt.err (!%p2699_p2)
}
   0xc   :  { %s2703_s16 = scalar_lea.vmem %s38_s28, 512  ;;  %p2708_p4 = scmp.lt.s32.totalorder %s38_s28, %s38_s28 }
   0xd   :  { %p2704_p3 = scmp.ne.s32.totalorder %s38_s28, %s2703_s16  ;;  %p2709_p5 = scmp.lt.s32.totalorder %s2703_s16, %s2703_s16 }
   0xf   :  { %p2710_p6 = por %p2709_p5, %p2708_p4 }
  0x11   :  { %p2711_p7 = pnand %p2710_p6, %p2704_p3 }
  0x13   :  { %2714 = shalt.err (!%p2711_p7)
}
  0x14   :  { %40 = dma.hbm_to_vmem [thread:$0]  %s3464_s1, 512, %s38_s28, [#allocation9]  }
  0x15   :  { %s2715_s21 = scalar_lea.hbm %s3463_s0, 1024 }
  0x16   :  { %p2716_p8 = scmp.ne.s32.totalorder %s3463_s0, %s2715_s21  ;;  %p2719_p9 = scmp.lt.u32.totalorder %s2715_s21, %s3463_s0 }
  0x18   :  { %p2721_p10 = pnand %p2719_p9, %p2716_p8 }
  0x1a   :  { %2724 = shalt.err (!%p2721_p10)
}
  0x1b   :  { %s2725_s26 = scalar_lea.vmem %s2914_s30, 1024  ;;  %p2730_p12 = scmp.lt.s32.totalorder %s2914_s30, %s2914_s30 }
  0x1c   :  { %p2726_p11 = scmp.ne.s32.totalorder %s2914_s30, %s2725_s26  ;;  %p2731_p13 = scmp.lt.s32.totalorder %s2725_s26, %s2725_s26 }
  0x1e   :  { %p2732_p0 = por %p2731_p13, %p2730_p12 }
  0x20   :  { %p2733_p1 = pnand %p2732_p0, %p2726_p11 }
  0x22   :  { %2736 = shalt.err (!%p2733_p1)
}
  0x23   :  { %s2859_s1 = smov 128   ;;  %s2860_s27 = smov 8  }
  0x24   :  { %30 = dma.hbm_to_vmem [thread:$0]  %s3463_s0, 1024, %s2914_s30, [#allocation6], %s2859_s1, %s2859_s1, %s2860_s27  }
  0x25   :  { %s2861_s9 = smov [#allocation10]   ;;  %s2737_s13 = scalar_lea.hbm %s3465_s2, 8192 }
  0x26   :  { %s46_s10 = sshll.u32 %s2861_s9, 4  ;;  %p2738_p2 = scmp.ne.s32.totalorder %s3465_s2, %s2737_s13  ;;  %s47_s10 = int_to_ptr.vmem [resolvable:$true] %s46_s10 }
  0x27   :  { %p2741_p3 = scmp.lt.u32.totalorder %s2737_s13, %s3465_s2 }
  0x29   :  { %p2743_p4 = pnand %p2741_p3, %p2738_p2 }
  0x2b   :  { %2746 = shalt.err (!%p2743_p4)
}
  0x2c   :  { %s2747_s18 = scalar_lea.vmem %s47_s10, 8192  ;;  %p2752_p6 = scmp.lt.s32.totalorder %s47_s10, %s47_s10 }
  0x2d   :  { %p2748_p5 = scmp.ne.s32.totalorder %s47_s10, %s2747_s18  ;;  %p2753_p7 = scmp.lt.s32.totalorder %s2747_s18, %s2747_s18 }
  0x2f   :  { %p2754_p8 = por %p2753_p7, %p2752_p6 }
  0x31   :  { %p2755_p9 = pnand %p2754_p8, %p2748_p5 }
  0x33   :  { %2758 = shalt.err (!%p2755_p9)
}
  0x34   :  { %s2862_s0 = smov 512   ;;  %s2863_s30 = smov 32  }
  0x35   :  { %52 = dma.hbm_to_vmem [thread:$0]  %s3465_s2, 8192, %s47_s10, [#allocation9], %s2862_s0, %s2862_s0, %s2863_s30  }
  0x36   :  { %s2864_s21 = smov [#allocation11]   ;;  %s2759_s25 = scalar_lea.hbm %s3466_s3, 64 }
  0x37   :  { %s59_s22 = sshll.u32 %s2864_s21, 4  ;;  %p2760_p10 = scmp.ne.s32.totalorder %s3466_s3, %s2759_s25  ;;  %s60_s22 = int_to_ptr.vmem [resolvable:$true] %s59_s22 }
  0x38   :  { %p2763_p11 = scmp.lt.u32.totalorder %s2759_s25, %s3466_s3 }
  0x3a   :  { %p2765_p12 = pnand %p2763_p11, %p2760_p10 }
  0x3c   :  { %2768 = shalt.err (!%p2765_p12)
}
  0x3d   :  { %s2769_s11 = scalar_lea.vmem %s60_s22, 64  ;;  %p2774_p0 = scmp.lt.s32.totalorder %s60_s22, %s60_s22 }
  0x3e   :  { %p2770_p13 = scmp.ne.s32.totalorder %s60_s22, %s2769_s11  ;;  %p2775_p1 = scmp.lt.s32.totalorder %s2769_s11, %s2769_s11 }
  0x40   :  { %p2776_p2 = por %p2775_p1, %p2774_p0 }
  0x42   :  { %p2777_p3 = pnand %p2776_p2, %p2770_p13 }
  0x44   :  { %2780 = shalt.err (!%p2777_p3)
}
  0x45   :  { %62 = dma.hbm_to_vmem [thread:$0]  %s3466_s3, 64, %s60_s22, [#allocation12]  }
  0x46   :  { %2847 = dma.done.wait [#allocation6], 1024  }
  0x47   :  { %2848 = vsyncadd [#allocation6], 4294966272 }
  0x48   :  { %2849 = dma.done.wait [#allocation9], 8704  }
  0x49   :  { %2850 = vsyncadd [#allocation9], 4294958592 }
  0x4a   :  { %2851 = dma.done.wait [#allocation12], 64  }
  0x4b   :  { %2852 = vsyncadd [#allocation12], 4294967232  ;;  %v2865_v0 = vmov 0.0   ;;  %v96_v1 = vld [vmem:[#allocation8 + $0x8] sm:$0xff]  ;;  %v98_v2 = vld [vmem:[#allocation8 + $0x18] sm:$0xff]  ;;  %vm121_vm0 = vcmask 64512  }
  0x4c   :  { %210 = vmatprep.mubr.f32.mxu0 %v2865_v0  ;;  %323 = vmatprep.mubr.f32.mxu1 %v2865_v0  ;;  %v95_v3 = vld [vmem:[#allocation8] sm:$0xff]  ;;  %v97_v4 = vld [vmem:[#allocation8 + $0x10] sm:$0xff]  ;;  %v405_v6 = vld [vmem:[#allocation10 + $0x8] sm:$0xff]  ;;  %s2867_s15 = smov [#allocation13]   ;;  %s2868_s17 = smov [#allocation16]  }
  0x4d   :  { %146 = vmatprep.subr.mxu0 %v96_v1  ;;  %259 = vmatprep.subr.mxu1 %v98_v2  ;;  %v87_v5 = vld [vmem:[#allocation5] sm:$0xff]  ;;  %v409_v7 = vld [vmem:[#allocation10 + $0x28] sm:$0xff]  ;;  %v407_v8 = vld [vmem:[#allocation10 + $0x18] sm:$0xff]  ;;  %s1896_s16 = sshll.u32 %s2867_s15, 4  ;;  %s1919_s18 = sshll.u32 %s2868_s17, 4  ;;  %s3410_s16 = int_to_ptr.vmem [resolvable:$true] %s1896_s16  ;;  %s3412_s18 = int_to_ptr.vmem [resolvable:$true] %s1919_s18 }
  0x4e   :  { %147 = vmatpush1.msra.mxu0 %v95_v3  ;;  %260 = vmatpush1.msra.mxu1 %v97_v4  ;;  %v411_v9 = vld [vmem:[#allocation10 + $0x38] sm:$0xff]  ;;  %v2976_v10 = vpack.c.bf16 %v409_v7, %v405_v6  ;;  %v404_v12 = vld [vmem:[#allocation10] sm:$0xff]  ;;  %v406_v14 = vld [vmem:[#allocation10 + $0x10] sm:$0xff] }
  0x4f   :  { %1937 = vmatmul.mubr.msk.f32.vlgmr.msra.gmra.mrb[0].mxu0 %vm121_vm0, %v87_v5  ;;  %1945 = vmatmul.mubr.msk.f32.vlgmr.msra.gmra.mrb[0].mxu1 %vm121_vm0, %v87_v5  ;;  %v2978_v11 = vpack.c.bf16 %v411_v9, %v407_v8  ;;  %v408_v13 = vld [vmem:[#allocation10 + $0x20] sm:$0xff]  ;;  %v410_v16 = vld [vmem:[#allocation10 + $0x30] sm:$0xff]  ;;  %v88_v17 = vld [vmem:[#allocation5 + $0x8] sm:$0xff] }
  0x50   :  { %v2980_v15 = vpack.c.bf16 %v408_v13, %v404_v12  ;;  %216 = vmatprep.mubr.f32.mxu0 %v2865_v0  ;;  %329 = vmatprep.mubr.f32.mxu1 %v2865_v0  ;;  %v413_v18 = vld [vmem:[#allocation10 + $0x48] sm:$0xff]  ;;  %v2986_v19 = vpack.c.bf16 %v410_v16, %v406_v14  ;;  %v415_v21 = vld [vmem:[#allocation10 + $0x58] sm:$0xff]  ;;  %v412_v25 = vld [vmem:[#allocation10 + $0x40] sm:$0xff] }
  0x51   :  { %1978 = vmatprep.subr.bf16.mxu0 %v2976_v10  ;;  %2010 = vmatprep.subr.bf16.mxu1 %v2978_v11  ;;  %v417_v20 = vld [vmem:[#allocation10 + $0x68] sm:$0xff]  ;;  %v419_v22 = vld [vmem:[#allocation10 + $0x78] sm:$0xff]  ;;  %v416_v26 = vld [vmem:[#allocation10 + $0x60] sm:$0xff] }
  0x52   :  { %1980 = vmatpush1.bf16.msra.mxu0 %v2980_v15  ;;  %v2989_v23 = vpack.c.bf16 %v417_v20, %v413_v18  ;;  %v2991_v24 = vpack.c.bf16 %v419_v22, %v415_v21  ;;  %v414_v27 = vld [vmem:[#allocation10 + $0x50] sm:$0xff]  ;;  %2012 = vmatpush1.bf16.msra.mxu1 %v2986_v19  ;;  %v2995_v28 = vpack.c.bf16 %v416_v26, %v412_v25  ;;  %v421_v31 = vld [vmem:[#allocation10 + $0x88] sm:$0xff]  ;;  %v423_v34 = vld [vmem:[#allocation10 + $0x98] sm:$0xff] }
  0x53   :  { %1938 = vmatmul.mubr.msk.f32.gmra.mrb[2].mxu0 %vm121_vm0, %v88_v17  ;;  %v418_v29 = vld [vmem:[#allocation10 + $0x70] sm:$0xff]  ;;  %1946 = vmatmul.mubr.msk.f32.gmra.mrb[2].mxu1 %vm121_vm0, %v88_v17  ;;  %v425_v33 = vld [vmem:[#allocation10 + $0xa8] sm:$0xff]  ;;  %v427_v35 = vld [vmem:[#allocation10 + $0xb8] sm:$0xff] }
  0x54   :  { %v89_v30 = vld [vmem:[#allocation5 + $0x10] sm:$0xff]  ;;  %1982 = vmatprep.subr.bf16.mxu0 %v2989_v23  ;;  %v2999_v32 = vpack.c.bf16 %v418_v29, %v414_v27  ;;  %2014 = vmatprep.subr.bf16.mxu1 %v2991_v24  ;;  %v3003_v36 = vpack.c.bf16 %v425_v33, %v421_v31  ;;  %v3005_v37 = vpack.c.bf16 %v427_v35, %v423_v34  ;;  %v420_v38 = vld [vmem:[#allocation10 + $0x80] sm:$0xff]  ;;  %v90_v43 = vld [vmem:[#allocation5 + $0x18] sm:$0xff] }
  0x55   :  { %222 = vmatprep.mubr.f32.mxu0 %v2865_v0  ;;  %v424_v39 = vld [vmem:[#allocation10 + $0xa0] sm:$0xff]  ;;  %v422_v40 = vld [vmem:[#allocation10 + $0x90] sm:$0xff]  ;;  %335 = vmatprep.mubr.f32.mxu1 %v2865_v0  ;;  %v429_v44 = vld [vmem:[#allocation10 + $0xc8] sm:$0xff] }
  0x56   :  { %1984 = vmatpush1.bf16.msra.mxu0 %v2995_v28  ;;  %v3009_v41 = vpack.c.bf16 %v424_v39, %v420_v38  ;;  %v426_v42 = vld [vmem:[#allocation10 + $0xb0] sm:$0xff]  ;;  %2016 = vmatpush1.bf16.msra.mxu1 %v2999_v32  ;;  %v433_v46 = vld [vmem:[#allocation10 + $0xe8] sm:$0xff]  ;;  %v431_v47 = vld [vmem:[#allocation10 + $0xd8] sm:$0xff] }
  0x57   :  { %1939 = vmatmul.mubr.msk.f32.gmra.mrb[4].mxu0 %vm121_vm0, %v89_v30  ;;  %v3013_v45 = vpack.c.bf16 %v426_v42, %v422_v40  ;;  %v435_v48 = vld [vmem:[#allocation10 + $0xf8] sm:$0xff]  ;;  %1947 = vmatmul.mubr.msk.f32.gmra.mrb[4].mxu1 %vm121_vm0, %v89_v30  ;;  %v3017_v49 = vpack.c.bf16 %v433_v46, %v429_v44  ;;  %v428_v50 = vld [vmem:[#allocation10 + $0xc0] sm:$0xff]  ;;  %v430_v52 = vld [vmem:[#allocation10 + $0xd0] sm:$0xff] }
  0x58   :  { %1986 = vmatprep.subr.bf16.mxu0 %v3003_v36  ;;  %v432_v51 = vld [vmem:[#allocation10 + $0xe0] sm:$0xff]  ;;  %2018 = vmatprep.subr.bf16.mxu1 %v3005_v37  ;;  %v3021_v53 = vpack.c.bf16 %v435_v48, %v431_v47  ;;  %v434_v54 = vld [vmem:[#allocation10 + $0xf0] sm:$0xff]  ;;  %v437_v55 = vld [vmem:[#allocation10 + $0x108] sm:$0xff] }
  0x59   :  { %228 = vmatprep.mubr.f32.mxu0 %v2865_v0  ;;  %341 = vmatprep.mubr.f32.mxu1 %v2865_v0  ;;  %v3025_v56 = vpack.c.bf16 %v432_v51, %v428_v50  ;;  %v441_v57 = vld [vmem:[#allocation10 + $0x128] sm:$0xff]  ;;  %v439_v58 = vld [vmem:[#allocation10 + $0x118] sm:$0xff]  ;;  %v3029_v60 = vpack.c.bf16 %v434_v54, %v430_v52  ;;  %v436_v61 = vld [vmem:[#allocation10 + $0x100] sm:$0xff] }
  0x5a   :  { %1988 = vmatpush1.bf16.msra.mxu0 %v3009_v41  ;;  %v443_v59 = vld [vmem:[#allocation10 + $0x138] sm:$0xff]  ;;  %2020 = vmatpush1.bf16.msra.mxu1 %v3013_v45  ;;  %v440_v62 = vld [vmem:[#allocation10 + $0x120] sm:$0xff]  ;;  %v3033_v1 = vpack.c.bf16 %v441_v57, %v437_v55  ;;  %v438_v2 = vld [vmem:[#allocation10 + $0x110] sm:$0xff] }
  0x5b   :  { %1940 = vmatmul.mubr.msk.f32.gmra.mrb[6].mxu0 %vm121_vm0, %v90_v43  ;;  %1948 = vmatmul.mubr.msk.f32.gmra.mrb[6].mxu1 %vm121_vm0, %v90_v43  ;;  %v91_v63 = vld [vmem:[#allocation5 + $0x20] sm:$0xff]  ;;  %v442_v3 = vld [vmem:[#allocation10 + $0x130] sm:$0xff]  ;;  %v3037_v4 = vpack.c.bf16 %v443_v59, %v439_v58  ;;  %v445_v5 = vld [vmem:[#allocation10 + $0x148] sm:$0xff]  ;;  %v3041_v7 = vpack.c.bf16 %v440_v62, %v436_v61 }
  0x5c   :  { %1990 = vmatprep.subr.bf16.mxu0 %v3017_v49  ;;  %2022 = vmatprep.subr.bf16.mxu1 %v3021_v53  ;;  %v449_v6 = vld [vmem:[#allocation10 + $0x168] sm:$0xff]  ;;  %v447_v8 = vld [vmem:[#allocation10 + $0x158] sm:$0xff]  ;;  %v3045_v12 = vpack.c.bf16 %v442_v3, %v438_v2  ;;  %v444_v13 = vld [vmem:[#allocation10 + $0x140] sm:$0xff] }
  0x5d   :  { %234 = vmatprep.mubr.f32.mxu0 %v2865_v0  ;;  %347 = vmatprep.mubr.f32.mxu1 %v2865_v0  ;;  %v451_v9 = vld [vmem:[#allocation10 + $0x178] sm:$0xff]  ;;  %v448_v14 = vld [vmem:[#allocation10 + $0x160] sm:$0xff]  ;;  %v92_v16 = vld [vmem:[#allocation5 + $0x28] sm:$0xff]  ;;  %v3049_v17 = vpack.c.bf16 %v449_v6, %v445_v5 }
  0x5e   :  { %1992 = vmatpush1.bf16.msra.mxu0 %v3025_v56  ;;  %2024 = vmatpush1.bf16.msra.mxu1 %v3029_v60  ;;  %v446_v18 = vld [vmem:[#allocation10 + $0x150] sm:$0xff]  ;;  %v3053_v21 = vpack.c.bf16 %v451_v9, %v447_v8  ;;  %v453_v22 = vld [vmem:[#allocation10 + $0x188] sm:$0xff]  ;;  %v3057_v26 = vpack.c.bf16 %v448_v14, %v444_v13  ;;  %v455_v27 = vld [vmem:[#allocation10 + $0x198] sm:$0xff] }
  0x5f   :  { %1941 = vmatmul.mubr.msk.f32.gmra.mrb[8].mxu0 %vm121_vm0, %v91_v63  ;;  %1949 = vmatmul.mubr.msk.f32.gmra.mrb[8].mxu1 %vm121_vm0, %v91_v63  ;;  %v450_v20 = vld [vmem:[#allocation10 + $0x170] sm:$0xff]  ;;  %v457_v25 = vld [vmem:[#allocation10 + $0x1a8] sm:$0xff]  ;;  %v459_v29 = vld [vmem:[#allocation10 + $0x1b8] sm:$0xff]  ;;  %v101_v63 = vlaneseq }
  0x60   :  { %1994 = vmatprep.subr.bf16.mxu0 %v3033_v1  ;;  %2026 = vmatprep.subr.bf16.mxu1 %v3037_v4  ;;  %v3061_v30 = vpack.c.bf16 %v450_v20, %v446_v18  ;;  %v452_v31 = vld [vmem:[#allocation10 + $0x180] sm:$0xff]  ;;  %v93_v34 = vld [vmem:[#allocation5 + $0x30] sm:$0xff]  ;;  %v3065_v35 = vpack.c.bf16 %v457_v25, %v453_v22  ;;  %v3069_v40 = vpack.c.bf16 %v459_v29, %v455_v27  ;;  %v461_v42 = vld [vmem:[#allocation10 + $0x1c8] sm:$0xff] }
  0x61   :  { %240 = vmatprep.mubr.f32.mxu0 %v2865_v0  ;;  %353 = vmatprep.mubr.f32.mxu1 %v2865_v0  ;;  %v456_v33 = vld [vmem:[#allocation10 + $0x1a0] sm:$0xff]  ;;  %v454_v38 = vld [vmem:[#allocation10 + $0x190] sm:$0xff]  ;;  %v465_v43 = vld [vmem:[#allocation10 + $0x1e8] sm:$0xff]  ;;  %v102_v2 = vshrl.u32 %v101_v63, 7 }
  0x62   :  { %1996 = vmatpush1.bf16.msra.mxu0 %v3041_v7  ;;  %2028 = vmatpush1.bf16.msra.mxu1 %v3045_v12  ;;  %v458_v39 = vld [vmem:[#allocation10 + $0x1b0] sm:$0xff]  ;;  %v3073_v44 = vpack.c.bf16 %v456_v33, %v452_v31  ;;  %v463_v46 = vld [vmem:[#allocation10 + $0x1d8] sm:$0xff]  ;;  %v460_v50 = vld [vmem:[#allocation10 + $0x1c0] sm:$0xff]  ;;  %v3081_v54 = vpack.c.bf16 %v465_v43, %v461_v42 }
  0x63   :  { %1942 = vmatmul.mubr.msk.f32.gmra.mrb[10].mxu0 %vm121_vm0, %v92_v16  ;;  %1950 = vmatmul.mubr.msk.f32.gmra.mrb[10].mxu1 %vm121_vm0, %v92_v16  ;;  %v467_v47 = vld [vmem:[#allocation10 + $0x1f8] sm:$0xff]  ;;  %v3077_v48 = vpack.c.bf16 %v458_v39, %v454_v38  ;;  %v464_v51 = vld [vmem:[#allocation10 + $0x1e0] sm:$0xff]  ;;  %v462_v55 = vld [vmem:[#allocation10 + $0x1d0] sm:$0xff]  ;;  %v103_v3 = vsub.s32 0, %v102_v2  ;;  %v107_v6 = vsub.s32 1, %v102_v2  ;;  %v115_v14 = vsub.s32 3, %v102_v2 }
  0x64   :  { %1998 = vmatprep.subr.bf16.mxu0 %v3049_v17  ;;  %2030 = vmatprep.subr.bf16.mxu1 %v3053_v21  ;;  %v94_v52 = vld [vmem:[#allocation5 + $0x38] sm:$0xff]  ;;  %v466_v57 = vld [vmem:[#allocation10 + $0x1f0] sm:$0xff]  ;;  %v3085_v58 = vpack.c.bf16 %v467_v47, %v463_v46  ;;  %v3089_v59 = vpack.c.bf16 %v464_v51, %v460_v50  ;;  %v83_v62 = vld [vmem:[%s3467_s4] sm:$0xff]  ;;  %v111_v33 = vsub.s32 2, %v102_v2 }
  0x65   :  { %246 = vmatprep.mubr.f32.mxu0 %v2865_v0  ;;  %359 = vmatprep.mubr.f32.mxu1 %v2865_v0  ;;  %v3093_v61 = vpack.c.bf16 %v466_v57, %v462_v55  ;;  %v99_v5 = vld [vmem:[#allocation11] sm:$0xf] }
  0x66   :  { %2000 = vmatpush1.bf16.msra.mxu0 %v3057_v26  ;;  %2032 = vmatpush1.bf16.msra.mxu1 %v3061_v30  ;;  %v3141_v8 = vrot.slane %v99_v5, %v103_v3  ;;  %v3143_v9 = vrot.slane %v99_v5, %v107_v6  ;;  %v3147_v31 = vrot.slane %v99_v5, %v115_v14  ;;  %v85_v55 = vld [vmem:[%s3468_s5] sm:$0xff]  ;;  %s2866_s5 = smov [#allocation14]  }
  0x67   :  { %1943 = vmatmul.mubr.msk.f32.gmra.mrb[12].mxu0 %vm121_vm0, %v93_v34  ;;  %1951 = vmatmul.mubr.msk.f32.gmra.mrb[12].mxu1 %vm121_vm0, %v93_v34  ;;  %v3150_v38 = vrot.slane %v99_v5, %v111_v33  ;;  %s1909_s14 = sshll.u32 %s2866_s5, 4  ;;  %s1910_s14 = int_to_ptr.vmem [resolvable:$true] %s1909_s14 }
  0x68   :  { %2002 = vmatprep.subr.bf16.mxu0 %v3065_v35  ;;  %2034 = vmatprep.subr.bf16.mxu1 %v3069_v40  ;;  %s2781_s0 = scalar_lea.vmem %s1910_s14, 128  ;;  %p2786_p5 = scmp.lt.s32.totalorder %s1910_s14, %s1910_s14 }
  0x69   :  { %252 = vmatprep.mubr.f32.mxu0 %v2865_v0  ;;  %365 = vmatprep.mubr.f32.mxu1 %v2865_v0  ;;  %p2782_p4 = scmp.ne.s32.totalorder %s1910_s14, %s2781_s0  ;;  %p2787_p6 = scmp.lt.s32.totalorder %s2781_s0, %s2781_s0 }
  0x6a   :  { %2004 = vmatpush1.bf16.msra.mxu0 %v3073_v44  ;;  %2036 = vmatpush1.bf16.msra.mxu1 %v3077_v48 }
  0x6b   :  { %1944 = vmatmul.mubr.msk.f32.gmra.mrb[14].mxu0 %vm121_vm0, %v94_v52  ;;  %1952 = vmatmul.mubr.msk.f32.gmra.mrb[14].mxu1 %vm121_vm0, %v94_v52  ;;  %p2788_p7 = por %p2787_p6, %p2786_p5 }
  0x6c   :  { %2006 = vmatprep.subr.bf16.mxu0 %v3081_v54  ;;  %2038 = vmatprep.subr.bf16.mxu1 %v3085_v58 }
  0x6d   :  { %538 = vmatprep.mubr.f32.mxu0 %v2865_v0  ;;  %609 = vmatprep.mubr.f32.mxu1 %v2865_v0  ;;  %p2789_p8 = pnand %p2788_p7, %p2782_p4 }
  0x6e   :  { %2008 = vmatpush1.bf16.msra.mxu0 %v3089_v59  ;;  %2040 = vmatpush1.bf16.msra.mxu1 %v3093_v61 }
  0x6f   :  { %2042 = vmatprep.subr.bf16.mxu0 %v2976_v10  ;;  %2074 = vmatprep.subr.bf16.mxu1 %v2978_v11 }
  0x71   :  { %539 = vmatmul.mubr.f32.vlgmr.msra.gmra.mrb[0].mxu0 %v83_v62  ;;  %610 = vmatmul.mubr.f32.vlgmr.msra.gmra.mrb[0].mxu1 %v83_v62 }
  0x72   :  { %2044 = vmatpush1.bf16.msra.mxu0 %v2980_v15  ;;  %2076 = vmatpush1.bf16.msra.mxu1 %v2986_v19 }
  0x73   :  { %2046 = vmatprep.subr.bf16.mxu0 %v2989_v23  ;;  %2078 = vmatprep.subr.bf16.mxu1 %v2991_v24 }
  0x74   :  { %714 = vmatprep.mubr.f32.mxu0 %v2865_v0  ;;  %785 = vmatprep.mubr.f32.mxu1 %v2865_v0 }
  0x76   :  { %2048 = vmatpush1.bf16.msra.mxu0 %v2995_v28  ;;  %2080 = vmatpush1.bf16.msra.mxu1 %v2999_v32 }
  0x77   :  { %2050 = vmatprep.subr.bf16.mxu0 %v3003_v36  ;;  %2082 = vmatprep.subr.bf16.mxu1 %v3005_v37 }
  0x7a   :  { %2052 = vmatpush1.bf16.msra.mxu0 %v3009_v41  ;;  %2084 = vmatpush1.bf16.msra.mxu1 %v3013_v45 }
  0x7b   :  { %2054 = vmatprep.subr.bf16.mxu0 %v3017_v49  ;;  %2086 = vmatprep.subr.bf16.mxu1 %v3021_v53 }
  0x7e   :  { %2056 = vmatpush1.bf16.msra.mxu0 %v3025_v56  ;;  %2088 = vmatpush1.bf16.msra.mxu1 %v3029_v60 }
  0x7f   :  { %2058 = vmatprep.subr.bf16.mxu0 %v3033_v1  ;;  %2090 = vmatprep.subr.bf16.mxu1 %v3037_v4 }
  0x82   :  { %2060 = vmatpush1.bf16.msra.mxu0 %v3041_v7  ;;  %2092 = vmatpush1.bf16.msra.mxu1 %v3045_v12 }
  0x83   :  { %2062 = vmatprep.subr.bf16.mxu0 %v3049_v17  ;;  %2094 = vmatprep.subr.bf16.mxu1 %v3053_v21 }
  0x86   :  { %2064 = vmatpush1.bf16.msra.mxu0 %v3057_v26  ;;  %2096 = vmatpush1.bf16.msra.mxu1 %v3061_v30 }
  0x87   :  { %2066 = vmatprep.subr.bf16.mxu0 %v3065_v35  ;;  %2098 = vmatprep.subr.bf16.mxu1 %v3069_v40 }
  0x8a   :  { %2068 = vmatpush1.bf16.msra.mxu0 %v3073_v44  ;;  %2100 = vmatpush1.bf16.msra.mxu1 %v3077_v48 }
  0x8b   :  { %2070 = vmatprep.subr.bf16.mxu0 %v3081_v54  ;;  %2102 = vmatprep.subr.bf16.mxu1 %v3085_v58 }
  0x8e   :  { %2072 = vmatpush1.bf16.msra.mxu0 %v3089_v59  ;;  %2104 = vmatpush1.bf16.msra.mxu1 %v3093_v61 }
  0x8f   :  { %2106 = vmatprep.subr.bf16.mxu0 %v2976_v10  ;;  %2138 = vmatprep.subr.bf16.mxu1 %v2978_v11 }
 0x144   :  { %v540_v13 = vpop.f32.mrb[0].mxu0  ;;  %v611_v18 = vpop.f32.mrb[0].mxu1 }
 0x145   :  { %v2489_v16 = vadd.f32 %v540_v13, %v3141_v8  ;;  %v542_v20 = vpop.f32.mrb[1].mxu0  ;;  %v613_v25 = vpop.f32.mrb[1].mxu1  ;;  %v2505_v42 = vadd.f32 %v611_v18, %v3150_v38 }
 0x146   :  { %v2490_v22 = vadd.f32 %v542_v20, %v3143_v9  ;;  %v2506_v34 = vadd.f32 %v613_v25, %v3147_v31 }
 0x147   :  { %v1953_v27 = vmul.f32 -1.442695, %v2489_v16 }
 0x148   :  { %v1954_v29 = vmul.f32 -1.442695, %v2490_v22  ;;  %v1955_v39 = vmul.f32 -1.442695, %v2506_v34 }
 0x149   :  { %2565 = vpow2.f32 %v1953_v27 }
 0x14a   :  { %2567 = vpow2.f32 %v1954_v29 }
 0x14b   :  { %2569 = vpow2.f32 %v1955_v39 }
 0x14c   :  { %2571 = vtanh.f32 %v2505_v42 }
 0x153   :  { %v2566_v43 = vpop.eup %2565 }
 0x154   :  { %v2568_v46 = vpop.eup %2567  ;;  %v623_v47 = vadd.f32 1.0, %v2566_v43 }
 0x155   :  { %v629_v50 = vadd.f32 1.0, %v2568_v46  ;;  %v2570_v51 = vpop.eup %2569 }
 0x156   :  { %2573 = vrcp.f32 %v623_v47  ;;  %v2572_v52 = vpop.eup %2571  ;;  %v636_v2 = vadd.f32 1.0, %v2570_v51 }
 0x157   :  { %2575 = vrcp.f32 %v629_v50 }
 0x158   :  { %2577 = vrcp.f32 %v636_v2 }
 0x160   :  { %v2574_v57 = vpop.eup %2573 }
 0x161   :  { %v2576_v62 = vpop.eup %2575  ;;  %v640_v63 = vmul.f32 %v2574_v57, %v2572_v52 }
 0x162   :  { %v639_v3 = vmul.f32 %v2576_v62, %v85_v55  ;;  %v2578_v6 = vpop.eup %2577 }
 0x164   :  { %v3156_v5 = vadd.f32 %v640_v63, %v639_v3 }
 0x166   :  { %2579 = vtanh.f32 %v3156_v5 }
 0x170   :  { %v2580_v13 = vpop.eup %2579 }
 0x171   :  { %v643_v14 = vmul.f32 %v2580_v13, %v2578_v6 }
 0x173   :  { %644 = vst [vmem:[#allocation13] sm:$0xff] %v643_v14  ;;  %715 = vmatmul.mubr.f32.vlgmr.msra.gmra.mrb[2].mxu0 %v643_v14  ;;  %786 = vmatmul.mubr.f32.vlgmr.msra.gmra.mrb[2].mxu1 %v643_v14 }
 0x174   :  { %2108 = vmatpush1.bf16.msra.mxu0 %v2980_v15  ;;  %2140 = vmatpush1.bf16.msra.mxu1 %v2986_v19 }
 0x175   :  { %2110 = vmatprep.subr.bf16.mxu0 %v2989_v23  ;;  %2142 = vmatprep.subr.bf16.mxu1 %v2991_v24 }
 0x176   :  { %891 = vmatprep.mubr.f32.mxu0 %v2865_v0  ;;  %962 = vmatprep.mubr.f32.mxu1 %v2865_v0 }
 0x178   :  { %2112 = vmatpush1.bf16.msra.mxu0 %v2995_v28  ;;  %2144 = vmatpush1.bf16.msra.mxu1 %v2999_v32 }
 0x179   :  { %2114 = vmatprep.subr.bf16.mxu0 %v3003_v36  ;;  %2146 = vmatprep.subr.bf16.mxu1 %v3005_v37 }
 0x17c   :  { %2116 = vmatpush1.bf16.msra.mxu0 %v3009_v41  ;;  %2148 = vmatpush1.bf16.msra.mxu1 %v3013_v45 }
 0x17d   :  { %2118 = vmatprep.subr.bf16.mxu0 %v3017_v49  ;;  %2150 = vmatprep.subr.bf16.mxu1 %v3021_v53 }
 0x180   :  { %2120 = vmatpush1.bf16.msra.mxu0 %v3025_v56  ;;  %2152 = vmatpush1.bf16.msra.mxu1 %v3029_v60 }
 0x181   :  { %2122 = vmatprep.subr.bf16.mxu0 %v3033_v1  ;;  %2154 = vmatprep.subr.bf16.mxu1 %v3037_v4 }
 0x184   :  { %2124 = vmatpush1.bf16.msra.mxu0 %v3041_v7  ;;  %2156 = vmatpush1.bf16.msra.mxu1 %v3045_v12 }
 0x185   :  { %2126 = vmatprep.subr.bf16.mxu0 %v3049_v17  ;;  %2158 = vmatprep.subr.bf16.mxu1 %v3053_v21 }
 0x188   :  { %2128 = vmatpush1.bf16.msra.mxu0 %v3057_v26  ;;  %2160 = vmatpush1.bf16.msra.mxu1 %v3061_v30 }
 0x189   :  { %2130 = vmatprep.subr.bf16.mxu0 %v3065_v35  ;;  %2162 = vmatprep.subr.bf16.mxu1 %v3069_v40 }
 0x18c   :  { %2132 = vmatpush1.bf16.msra.mxu0 %v3073_v44  ;;  %2164 = vmatpush1.bf16.msra.mxu1 %v3077_v48 }
 0x18d   :  { %2134 = vmatprep.subr.bf16.mxu0 %v3081_v54  ;;  %2166 = vmatprep.subr.bf16.mxu1 %v3085_v58 }
 0x190   :  { %2136 = vmatpush1.bf16.msra.mxu0 %v3089_v59  ;;  %2168 = vmatpush1.bf16.msra.mxu1 %v3093_v61 }
 0x191   :  { %2170 = vmatprep.subr.bf16.mxu0 %v2976_v10  ;;  %2202 = vmatprep.subr.bf16.mxu1 %v2978_v11 }
 0x246   :  { %v716_v16 = vpop.f32.mrb[2].mxu0  ;;  %v787_v18 = vpop.f32.mrb[2].mxu1 }
 0x247   :  { %v2491_v20 = vadd.f32 %v716_v16, %v3141_v8  ;;  %v718_v22 = vpop.f32.mrb[3].mxu0  ;;  %v789_v25 = vpop.f32.mrb[3].mxu1  ;;  %v2507_v42 = vadd.f32 %v787_v18, %v3150_v38 }
 0x248   :  { %v2492_v27 = vadd.f32 %v718_v22, %v3143_v9  ;;  %v2508_v34 = vadd.f32 %v789_v25, %v3147_v31 }
 0x249   :  { %v1956_v29 = vmul.f32 -1.442695, %v2491_v20 }
 0x24a   :  { %v1957_v33 = vmul.f32 -1.442695, %v2492_v27  ;;  %v1958_v39 = vmul.f32 -1.442695, %v2508_v34 }
 0x24b   :  { %2581 = vpow2.f32 %v1956_v29 }
 0x24c   :  { %2583 = vpow2.f32 %v1957_v33 }
 0x24d   :  { %2585 = vpow2.f32 %v1958_v39 }
 0x24e   :  { %2587 = vtanh.f32 %v2507_v42 }
 0x255   :  { %v2582_v43 = vpop.eup %2581 }
 0x256   :  { %v2584_v46 = vpop.eup %2583  ;;  %v799_v47 = vadd.f32 1.0, %v2582_v43 }
 0x257   :  { %v805_v50 = vadd.f32 1.0, %v2584_v46  ;;  %v2586_v51 = vpop.eup %2585 }
 0x258   :  { %2589 = vrcp.f32 %v799_v47  ;;  %v2588_v52 = vpop.eup %2587  ;;  %v812_v63 = vadd.f32 1.0, %v2586_v51 }
 0x259   :  { %2591 = vrcp.f32 %v805_v50 }
 0x25a   :  { %2593 = vrcp.f32 %v812_v63 }
 0x262   :  { %v2590_v55 = vpop.eup %2589 }
 0x263   :  { %v2592_v57 = vpop.eup %2591  ;;  %v816_v62 = vmul.f32 %v2590_v55, %v2588_v52 }
 0x264   :  { %v815_v2 = vmul.f32 %v2592_v57, %v3156_v5  ;;  %v2594_v6 = vpop.eup %2593 }
 0x266   :  { %v3198_v3 = vadd.f32 %v816_v62, %v815_v2 }
 0x268   :  { %2595 = vtanh.f32 %v3198_v3 }
 0x272   :  { %v2596_v13 = vpop.eup %2595 }
 0x273   :  { %v819_v14 = vmul.f32 %v2596_v13, %v2594_v6 }
 0x275   :  { %821 = vst [vmem:[#allocation13 + $0x8] sm:$0xff] %v819_v14  ;;  %892 = vmatmul.mubr.f32.vlgmr.msra.gmra.mrb[4].mxu0 %v819_v14  ;;  %963 = vmatmul.mubr.f32.vlgmr.msra.gmra.mrb[4].mxu1 %v819_v14 }
 0x276   :  { %2172 = vmatpush1.bf16.msra.mxu0 %v2980_v15  ;;  %2204 = vmatpush1.bf16.msra.mxu1 %v2986_v19 }
 0x277   :  { %2174 = vmatprep.subr.bf16.mxu0 %v2989_v23  ;;  %2206 = vmatprep.subr.bf16.mxu1 %v2991_v24 }
 0x278   :  { %1068 = vmatprep.mubr.f32.mxu0 %v2865_v0  ;;  %1139 = vmatprep.mubr.f32.mxu1 %v2865_v0 }
 0x27a   :  { %2176 = vmatpush1.bf16.msra.mxu0 %v2995_v28  ;;  %2208 = vmatpush1.bf16.msra.mxu1 %v2999_v32 }
 0x27b   :  { %2178 = vmatprep.subr.bf16.mxu0 %v3003_v36  ;;  %2210 = vmatprep.subr.bf16.mxu1 %v3005_v37 }
 0x27e   :  { %2180 = vmatpush1.bf16.msra.mxu0 %v3009_v41  ;;  %2212 = vmatpush1.bf16.msra.mxu1 %v3013_v45 }
 0x27f   :  { %2182 = vmatprep.subr.bf16.mxu0 %v3017_v49  ;;  %2214 = vmatprep.subr.bf16.mxu1 %v3021_v53 }
 0x282   :  { %2184 = vmatpush1.bf16.msra.mxu0 %v3025_v56  ;;  %2216 = vmatpush1.bf16.msra.mxu1 %v3029_v60 }
 0x283   :  { %2186 = vmatprep.subr.bf16.mxu0 %v3033_v1  ;;  %2218 = vmatprep.subr.bf16.mxu1 %v3037_v4 }
 0x286   :  { %2188 = vmatpush1.bf16.msra.mxu0 %v3041_v7  ;;  %2220 = vmatpush1.bf16.msra.mxu1 %v3045_v12 }
 0x287   :  { %2190 = vmatprep.subr.bf16.mxu0 %v3049_v17  ;;  %2222 = vmatprep.subr.bf16.mxu1 %v3053_v21 }
 0x28a   :  { %2192 = vmatpush1.bf16.msra.mxu0 %v3057_v26  ;;  %2224 = vmatpush1.bf16.msra.mxu1 %v3061_v30 }
 0x28b   :  { %2194 = vmatprep.subr.bf16.mxu0 %v3065_v35  ;;  %2226 = vmatprep.subr.bf16.mxu1 %v3069_v40 }
 0x28e   :  { %2196 = vmatpush1.bf16.msra.mxu0 %v3073_v44  ;;  %2228 = vmatpush1.bf16.msra.mxu1 %v3077_v48 }
 0x28f   :  { %2198 = vmatprep.subr.bf16.mxu0 %v3081_v54  ;;  %2230 = vmatprep.subr.bf16.mxu1 %v3085_v58 }
 0x292   :  { %2200 = vmatpush1.bf16.msra.mxu0 %v3089_v59  ;;  %2232 = vmatpush1.bf16.msra.mxu1 %v3093_v61 }
 0x293   :  { %2234 = vmatprep.subr.bf16.mxu0 %v2976_v10  ;;  %2266 = vmatprep.subr.bf16.mxu1 %v2978_v11 }
 0x348   :  { %v893_v5 = vpop.f32.mrb[4].mxu0  ;;  %v964_v16 = vpop.f32.mrb[4].mxu1 }
 0x349   :  { %v2493_v18 = vadd.f32 %v893_v5, %v3141_v8  ;;  %v895_v20 = vpop.f32.mrb[5].mxu0  ;;  %v966_v22 = vpop.f32.mrb[5].mxu1  ;;  %v2509_v39 = vadd.f32 %v964_v16, %v3150_v38 }
 0x34a   :  { %v2494_v25 = vadd.f32 %v895_v20, %v3143_v9  ;;  %v2510_v33 = vadd.f32 %v966_v22, %v3147_v31 }
 0x34b   :  { %v1959_v27 = vmul.f32 -1.442695, %v2493_v18 }
 0x34c   :  { %v1960_v29 = vmul.f32 -1.442695, %v2494_v25  ;;  %v1961_v34 = vmul.f32 -1.442695, %v2510_v33 }
 0x34d   :  { %2597 = vpow2.f32 %v1959_v27 }
 0x34e   :  { %2599 = vpow2.f32 %v1960_v29 }
 0x34f   :  { %2601 = vpow2.f32 %v1961_v34 }
 0x350   :  { %2603 = vtanh.f32 %v2509_v39 }
 0x357   :  { %v2598_v42 = vpop.eup %2597 }
 0x358   :  { %v2600_v43 = vpop.eup %2599  ;;  %v976_v46 = vadd.f32 1.0, %v2598_v42 }
 0x359   :  { %v982_v47 = vadd.f32 1.0, %v2600_v43  ;;  %v2602_v50 = vpop.eup %2601 }
 0x35a   :  { %2605 = vrcp.f32 %v976_v46  ;;  %v2604_v51 = vpop.eup %2603  ;;  %v989_v62 = vadd.f32 1.0, %v2602_v50 }
 0x35b   :  { %2607 = vrcp.f32 %v982_v47 }
 0x35c   :  { %2609 = vrcp.f32 %v989_v62 }
 0x364   :  { %v2606_v52 = vpop.eup %2605 }
 0x365   :  { %v2608_v55 = vpop.eup %2607  ;;  %v993_v57 = vmul.f32 %v2606_v52, %v2604_v51 }
 0x366   :  { %v992_v63 = vmul.f32 %v2608_v55, %v3198_v3  ;;  %v2610_v6 = vpop.eup %2609 }
 0x368   :  { %v3240_v2 = vadd.f32 %v993_v57, %v992_v63 }
 0x36a   :  { %2611 = vtanh.f32 %v3240_v2 }
 0x374   :  { %v2612_v13 = vpop.eup %2611 }
 0x375   :  { %v996_v14 = vmul.f32 %v2612_v13, %v2610_v6 }
 0x377   :  { %998 = vst [vmem:[#allocation13 + $0x10] sm:$0xff] %v996_v14  ;;  %1069 = vmatmul.mubr.f32.vlgmr.msra.gmra.mrb[6].mxu0 %v996_v14  ;;  %1140 = vmatmul.mubr.f32.vlgmr.msra.gmra.mrb[6].mxu1 %v996_v14 }
 0x378   :  { %2236 = vmatpush1.bf16.msra.mxu0 %v2980_v15  ;;  %2268 = vmatpush1.bf16.msra.mxu1 %v2986_v19 }
 0x379   :  { %2238 = vmatprep.subr.bf16.mxu0 %v2989_v23  ;;  %2270 = vmatprep.subr.bf16.mxu1 %v2991_v24 }
 0x37a   :  { %1245 = vmatprep.mubr.f32.mxu0 %v2865_v0  ;;  %1316 = vmatprep.mubr.f32.mxu1 %v2865_v0 }
 0x37c   :  { %2240 = vmatpush1.bf16.msra.mxu0 %v2995_v28  ;;  %2272 = vmatpush1.bf16.msra.mxu1 %v2999_v32 }
 0x37d   :  { %2242 = vmatprep.subr.bf16.mxu0 %v3003_v36  ;;  %2274 = vmatprep.subr.bf16.mxu1 %v3005_v37 }
 0x380   :  { %2244 = vmatpush1.bf16.msra.mxu0 %v3009_v41  ;;  %2276 = vmatpush1.bf16.msra.mxu1 %v3013_v45 }
 0x381   :  { %2246 = vmatprep.subr.bf16.mxu0 %v3017_v49  ;;  %2278 = vmatprep.subr.bf16.mxu1 %v3021_v53 }
 0x384   :  { %2248 = vmatpush1.bf16.msra.mxu0 %v3025_v56  ;;  %2280 = vmatpush1.bf16.msra.mxu1 %v3029_v60 }
 0x385   :  { %2250 = vmatprep.subr.bf16.mxu0 %v3033_v1  ;;  %2282 = vmatprep.subr.bf16.mxu1 %v3037_v4 }
 0x388   :  { %2252 = vmatpush1.bf16.msra.mxu0 %v3041_v7  ;;  %2284 = vmatpush1.bf16.msra.mxu1 %v3045_v12 }
 0x389   :  { %2254 = vmatprep.subr.bf16.mxu0 %v3049_v17  ;;  %2286 = vmatprep.subr.bf16.mxu1 %v3053_v21 }
 0x38c   :  { %2256 = vmatpush1.bf16.msra.mxu0 %v3057_v26  ;;  %2288 = vmatpush1.bf16.msra.mxu1 %v3061_v30 }
 0x38d   :  { %2258 = vmatprep.subr.bf16.mxu0 %v3065_v35  ;;  %2290 = vmatprep.subr.bf16.mxu1 %v3069_v40 }
 0x390   :  { %2260 = vmatpush1.bf16.msra.mxu0 %v3073_v44  ;;  %2292 = vmatpush1.bf16.msra.mxu1 %v3077_v48 }
 0x391   :  { %2262 = vmatprep.subr.bf16.mxu0 %v3081_v54  ;;  %2294 = vmatprep.subr.bf16.mxu1 %v3085_v58 }
 0x394   :  { %2264 = vmatpush1.bf16.msra.mxu0 %v3089_v59  ;;  %2296 = vmatpush1.bf16.msra.mxu1 %v3093_v61 }
 0x395   :  { %2298 = vmatprep.subr.bf16.mxu0 %v2976_v10  ;;  %2330 = vmatprep.subr.bf16.mxu1 %v2978_v11 }
 0x44a   :  { %v1070_v3 = vpop.f32.mrb[6].mxu0  ;;  %v1141_v5 = vpop.f32.mrb[6].mxu1 }
 0x44b   :  { %v2495_v16 = vadd.f32 %v1070_v3, %v3141_v8  ;;  %v1072_v18 = vpop.f32.mrb[7].mxu0  ;;  %v1143_v20 = vpop.f32.mrb[7].mxu1  ;;  %v2511_v34 = vadd.f32 %v1141_v5, %v3150_v38 }
 0x44c   :  { %v2496_v22 = vadd.f32 %v1072_v18, %v3143_v9  ;;  %v2512_v29 = vadd.f32 %v1143_v20, %v3147_v31 }
 0x44d   :  { %v1962_v25 = vmul.f32 -1.442695, %v2495_v16 }
 0x44e   :  { %v1963_v27 = vmul.f32 -1.442695, %v2496_v22  ;;  %v1964_v33 = vmul.f32 -1.442695, %v2512_v29 }
 0x44f   :  { %2613 = vpow2.f32 %v1962_v25 }
 0x450   :  { %2615 = vpow2.f32 %v1963_v27 }
 0x451   :  { %2617 = vpow2.f32 %v1964_v33 }
 0x452   :  { %2619 = vtanh.f32 %v2511_v34 }
 0x459   :  { %v2614_v39 = vpop.eup %2613 }
 0x45a   :  { %v2616_v42 = vpop.eup %2615  ;;  %v1153_v43 = vadd.f32 1.0, %v2614_v39 }
 0x45b   :  { %v1159_v46 = vadd.f32 1.0, %v2616_v42  ;;  %v2618_v47 = vpop.eup %2617 }
 0x45c   :  { %2621 = vrcp.f32 %v1153_v43  ;;  %v2620_v50 = vpop.eup %2619  ;;  %v1166_v57 = vadd.f32 1.0, %v2618_v47 }
 0x45d   :  { %2623 = vrcp.f32 %v1159_v46 }
 0x45e   :  { %2625 = vrcp.f32 %v1166_v57 }
 0x466   :  { %v2622_v51 = vpop.eup %2621 }
 0x467   :  { %v2624_v52 = vpop.eup %2623  ;;  %v1170_v55 = vmul.f32 %v2622_v51, %v2620_v50 }
 0x468   :  { %v1169_v62 = vmul.f32 %v2624_v52, %v3240_v2  ;;  %v2626_v6 = vpop.eup %2625 }
 0x46a   :  { %v3282_v63 = vadd.f32 %v1170_v55, %v1169_v62 }
 0x46c   :  { %2627 = vtanh.f32 %v3282_v63 }
 0x476   :  { %v2628_v13 = vpop.eup %2627 }
 0x477   :  { %v1173_v14 = vmul.f32 %v2628_v13, %v2626_v6 }
 0x479   :  { %1175 = vst [vmem:[#allocation13 + $0x18] sm:$0xff] %v1173_v14  ;;  %1246 = vmatmul.mubr.f32.vlgmr.msra.gmra.mrb[8].mxu0 %v1173_v14  ;;  %1317 = vmatmul.mubr.f32.vlgmr.msra.gmra.mrb[8].mxu1 %v1173_v14 }
 0x47a   :  { %2300 = vmatpush1.bf16.msra.mxu0 %v2980_v15  ;;  %2332 = vmatpush1.bf16.msra.mxu1 %v2986_v19 }
 0x47b   :  { %2302 = vmatprep.subr.bf16.mxu0 %v2989_v23  ;;  %2334 = vmatprep.subr.bf16.mxu1 %v2991_v24 }
 0x47c   :  { %1422 = vmatprep.mubr.f32.mxu0 %v2865_v0  ;;  %1493 = vmatprep.mubr.f32.mxu1 %v2865_v0 }
 0x47e   :  { %2304 = vmatpush1.bf16.msra.mxu0 %v2995_v28  ;;  %2336 = vmatpush1.bf16.msra.mxu1 %v2999_v32 }
 0x47f   :  { %2306 = vmatprep.subr.bf16.mxu0 %v3003_v36  ;;  %2338 = vmatprep.subr.bf16.mxu1 %v3005_v37 }
 0x482   :  { %2308 = vmatpush1.bf16.msra.mxu0 %v3009_v41  ;;  %2340 = vmatpush1.bf16.msra.mxu1 %v3013_v45 }
 0x483   :  { %2310 = vmatprep.subr.bf16.mxu0 %v3017_v49  ;;  %2342 = vmatprep.subr.bf16.mxu1 %v3021_v53 }
 0x486   :  { %2312 = vmatpush1.bf16.msra.mxu0 %v3025_v56  ;;  %2344 = vmatpush1.bf16.msra.mxu1 %v3029_v60 }
 0x487   :  { %2314 = vmatprep.subr.bf16.mxu0 %v3033_v1  ;;  %2346 = vmatprep.subr.bf16.mxu1 %v3037_v4 }
 0x48a   :  { %2316 = vmatpush1.bf16.msra.mxu0 %v3041_v7  ;;  %2348 = vmatpush1.bf16.msra.mxu1 %v3045_v12 }
 0x48b   :  { %2318 = vmatprep.subr.bf16.mxu0 %v3049_v17  ;;  %2350 = vmatprep.subr.bf16.mxu1 %v3053_v21 }
 0x48e   :  { %2320 = vmatpush1.bf16.msra.mxu0 %v3057_v26  ;;  %2352 = vmatpush1.bf16.msra.mxu1 %v3061_v30 }
 0x48f   :  { %2322 = vmatprep.subr.bf16.mxu0 %v3065_v35  ;;  %2354 = vmatprep.subr.bf16.mxu1 %v3069_v40 }
 0x492   :  { %2324 = vmatpush1.bf16.msra.mxu0 %v3073_v44  ;;  %2356 = vmatpush1.bf16.msra.mxu1 %v3077_v48 }
 0x493   :  { %2326 = vmatprep.subr.bf16.mxu0 %v3081_v54  ;;  %2358 = vmatprep.subr.bf16.mxu1 %v3085_v58 }
 0x496   :  { %2328 = vmatpush1.bf16.msra.mxu0 %v3089_v59  ;;  %2360 = vmatpush1.bf16.msra.mxu1 %v3093_v61 }
 0x497   :  { %2362 = vmatprep.subr.bf16.mxu0 %v2976_v10  ;;  %2394 = vmatprep.subr.bf16.mxu1 %v2978_v11 }
 0x54c   :  { %v1247_v2 = vpop.f32.mrb[8].mxu0  ;;  %v1318_v3 = vpop.f32.mrb[8].mxu1 }
 0x54d   :  { %v2497_v5 = vadd.f32 %v1247_v2, %v3141_v8  ;;  %v1249_v16 = vpop.f32.mrb[9].mxu0  ;;  %v1320_v18 = vpop.f32.mrb[9].mxu1  ;;  %v2513_v33 = vadd.f32 %v1318_v3, %v3150_v38 }
 0x54e   :  { %v2498_v20 = vadd.f32 %v1249_v16, %v3143_v9  ;;  %v2514_v27 = vadd.f32 %v1320_v18, %v3147_v31 }
 0x54f   :  { %v1965_v22 = vmul.f32 -1.442695, %v2497_v5 }
 0x550   :  { %v1966_v25 = vmul.f32 -1.442695, %v2498_v20  ;;  %v1967_v29 = vmul.f32 -1.442695, %v2514_v27 }
 0x551   :  { %2629 = vpow2.f32 %v1965_v22 }
 0x552   :  { %2631 = vpow2.f32 %v1966_v25 }
 0x553   :  { %2633 = vpow2.f32 %v1967_v29 }
 0x554   :  { %2635 = vtanh.f32 %v2513_v33 }
 0x55b   :  { %v2630_v34 = vpop.eup %2629 }
 0x55c   :  { %v2632_v39 = vpop.eup %2631  ;;  %v1330_v42 = vadd.f32 1.0, %v2630_v34 }
 0x55d   :  { %v1336_v43 = vadd.f32 1.0, %v2632_v39  ;;  %v2634_v46 = vpop.eup %2633 }
 0x55e   :  { %2637 = vrcp.f32 %v1330_v42  ;;  %v2636_v47 = vpop.eup %2635  ;;  %v1343_v55 = vadd.f32 1.0, %v2634_v46 }
 0x55f   :  { %2639 = vrcp.f32 %v1336_v43 }
 0x560   :  { %2641 = vrcp.f32 %v1343_v55 }
 0x568   :  { %v2638_v50 = vpop.eup %2637 }
 0x569   :  { %v2640_v51 = vpop.eup %2639  ;;  %v1347_v52 = vmul.f32 %v2638_v50, %v2636_v47 }
 0x56a   :  { %v1346_v57 = vmul.f32 %v2640_v51, %v3282_v63  ;;  %v2642_v6 = vpop.eup %2641 }
 0x56c   :  { %v3324_v62 = vadd.f32 %v1347_v52, %v1346_v57 }
 0x56e   :  { %2643 = vtanh.f32 %v3324_v62 }
 0x578   :  { %v2644_v13 = vpop.eup %2643 }
 0x579   :  { %v1350_v14 = vmul.f32 %v2644_v13, %v2642_v6 }
 0x57b   :  { %1352 = vst [vmem:[#allocation13 + $0x20] sm:$0xff] %v1350_v14  ;;  %1423 = vmatmul.mubr.f32.vlgmr.msra.gmra.mrb[10].mxu0 %v1350_v14  ;;  %1494 = vmatmul.mubr.f32.vlgmr.msra.gmra.mrb[10].mxu1 %v1350_v14 }
 0x57c   :  { %2364 = vmatpush1.bf16.msra.mxu0 %v2980_v15  ;;  %2396 = vmatpush1.bf16.msra.mxu1 %v2986_v19 }
 0x57d   :  { %2366 = vmatprep.subr.bf16.mxu0 %v2989_v23  ;;  %2398 = vmatprep.subr.bf16.mxu1 %v2991_v24 }
 0x57e   :  { %1599 = vmatprep.mubr.f32.mxu0 %v2865_v0  ;;  %1670 = vmatprep.mubr.f32.mxu1 %v2865_v0 }
 0x580   :  { %2368 = vmatpush1.bf16.msra.mxu0 %v2995_v28  ;;  %2400 = vmatpush1.bf16.msra.mxu1 %v2999_v32 }
 0x581   :  { %2370 = vmatprep.subr.bf16.mxu0 %v3003_v36  ;;  %2402 = vmatprep.subr.bf16.mxu1 %v3005_v37 }
 0x584   :  { %2372 = vmatpush1.bf16.msra.mxu0 %v3009_v41  ;;  %2404 = vmatpush1.bf16.msra.mxu1 %v3013_v45 }
 0x585   :  { %2374 = vmatprep.subr.bf16.mxu0 %v3017_v49  ;;  %2406 = vmatprep.subr.bf16.mxu1 %v3021_v53 }
 0x588   :  { %2376 = vmatpush1.bf16.msra.mxu0 %v3025_v56  ;;  %2408 = vmatpush1.bf16.msra.mxu1 %v3029_v60 }
 0x589   :  { %2378 = vmatprep.subr.bf16.mxu0 %v3033_v1  ;;  %2410 = vmatprep.subr.bf16.mxu1 %v3037_v4 }
 0x58c   :  { %2380 = vmatpush1.bf16.msra.mxu0 %v3041_v7  ;;  %2412 = vmatpush1.bf16.msra.mxu1 %v3045_v12 }
 0x58d   :  { %2382 = vmatprep.subr.bf16.mxu0 %v3049_v17  ;;  %2414 = vmatprep.subr.bf16.mxu1 %v3053_v21 }
 0x590   :  { %2384 = vmatpush1.bf16.msra.mxu0 %v3057_v26  ;;  %2416 = vmatpush1.bf16.msra.mxu1 %v3061_v30 }
 0x591   :  { %2386 = vmatprep.subr.bf16.mxu0 %v3065_v35  ;;  %2418 = vmatprep.subr.bf16.mxu1 %v3069_v40 }
 0x594   :  { %2388 = vmatpush1.bf16.msra.mxu0 %v3073_v44  ;;  %2420 = vmatpush1.bf16.msra.mxu1 %v3077_v48 }
 0x595   :  { %2390 = vmatprep.subr.bf16.mxu0 %v3081_v54  ;;  %2422 = vmatprep.subr.bf16.mxu1 %v3085_v58 }
 0x598   :  { %2392 = vmatpush1.bf16.msra.mxu0 %v3089_v59  ;;  %2424 = vmatpush1.bf16.msra.mxu1 %v3093_v61 }
 0x599   :  { %2426 = vmatprep.subr.bf16.mxu0 %v2976_v10  ;;  %2458 = vmatprep.subr.bf16.mxu1 %v2978_v11 }
 0x64e   :  { %v1424_v63 = vpop.f32.mrb[10].mxu0  ;;  %v1495_v2 = vpop.f32.mrb[10].mxu1 }
 0x64f   :  { %v2499_v3 = vadd.f32 %v1424_v63, %v3141_v8  ;;  %v1426_v5 = vpop.f32.mrb[11].mxu0  ;;  %v1497_v16 = vpop.f32.mrb[11].mxu1  ;;  %v2515_v29 = vadd.f32 %v1495_v2, %v3150_v38 }
 0x650   :  { %v2500_v18 = vadd.f32 %v1426_v5, %v3143_v9  ;;  %v2516_v25 = vadd.f32 %v1497_v16, %v3147_v31 }
 0x651   :  { %v1968_v20 = vmul.f32 -1.442695, %v2499_v3 }
 0x652   :  { %v1969_v22 = vmul.f32 -1.442695, %v2500_v18  ;;  %v1970_v27 = vmul.f32 -1.442695, %v2516_v25 }
 0x653   :  { %2645 = vpow2.f32 %v1968_v20 }
 0x654   :  { %2647 = vpow2.f32 %v1969_v22 }
 0x655   :  { %2649 = vpow2.f32 %v1970_v27 }
 0x656   :  { %2651 = vtanh.f32 %v2515_v29 }
 0x65d   :  { %v2646_v10 = vpop.eup %2645 }
 0x65e   :  { %v2648_v33 = vpop.eup %2647  ;;  %v1507_v11 = vadd.f32 1.0, %v2646_v10 }
 0x65f   :  { %v1513_v34 = vadd.f32 1.0, %v2648_v33  ;;  %v2650_v39 = vpop.eup %2649 }
 0x660   :  { %2653 = vrcp.f32 %v1507_v11  ;;  %v2652_v42 = vpop.eup %2651  ;;  %v1520_v50 = vadd.f32 1.0, %v2650_v39 }
 0x661   :  { %2655 = vrcp.f32 %v1513_v34 }
 0x662   :  { %2657 = vrcp.f32 %v1520_v50 }
 0x66a   :  { %v2654_v43 = vpop.eup %2653 }
 0x66b   :  { %v2656_v46 = vpop.eup %2655  ;;  %v1524_v47 = vmul.f32 %v2654_v43, %v2652_v42 }
 0x66c   :  { %v1523_v51 = vmul.f32 %v2656_v46, %v3324_v62  ;;  %v2658_v55 = vpop.eup %2657 }
 0x66e   :  { %v3366_v52 = vadd.f32 %v1524_v47, %v1523_v51 }
 0x670   :  { %2659 = vtanh.f32 %v3366_v52 }
 0x67a   :  { %v2660_v57 = vpop.eup %2659 }
 0x67b   :  { %v1527_v6 = vmul.f32 %v2660_v57, %v2658_v55 }
 0x67d   :  { %1529 = vst [vmem:[#allocation13 + $0x28] sm:$0xff] %v1527_v6  ;;  %1600 = vmatmul.mubr.f32.vlgmr.msra.gmra.mrb[12].mxu0 %v1527_v6  ;;  %1671 = vmatmul.mubr.f32.vlgmr.msra.gmra.mrb[12].mxu1 %v1527_v6 }
 0x67e   :  { %2428 = vmatpush1.bf16.msra.mxu0 %v2980_v15  ;;  %2460 = vmatpush1.bf16.msra.mxu1 %v2986_v19 }
 0x67f   :  { %2430 = vmatprep.subr.bf16.mxu0 %v2989_v23  ;;  %2462 = vmatprep.subr.bf16.mxu1 %v2991_v24 }
 0x680   :  { %1776 = vmatprep.mubr.f32.mxu0 %v2865_v0  ;;  %1847 = vmatprep.mubr.f32.mxu1 %v2865_v0 }
 0x682   :  { %2432 = vmatpush1.bf16.msra.mxu0 %v2995_v28  ;;  %2464 = vmatpush1.bf16.msra.mxu1 %v2999_v32 }
 0x683   :  { %2434 = vmatprep.subr.bf16.mxu0 %v3003_v36  ;;  %2466 = vmatprep.subr.bf16.mxu1 %v3005_v37 }
 0x686   :  { %2436 = vmatpush1.bf16.msra.mxu0 %v3009_v41  ;;  %2468 = vmatpush1.bf16.msra.mxu1 %v3013_v45 }
 0x687   :  { %2438 = vmatprep.subr.bf16.mxu0 %v3017_v49  ;;  %2470 = vmatprep.subr.bf16.mxu1 %v3021_v53 }
 0x68a   :  { %2440 = vmatpush1.bf16.msra.mxu0 %v3025_v56  ;;  %2472 = vmatpush1.bf16.msra.mxu1 %v3029_v60 }
 0x68b   :  { %2442 = vmatprep.subr.bf16.mxu0 %v3033_v1  ;;  %2474 = vmatprep.subr.bf16.mxu1 %v3037_v4 }
 0x68e   :  { %2444 = vmatpush1.bf16.msra.mxu0 %v3041_v7  ;;  %2476 = vmatpush1.bf16.msra.mxu1 %v3045_v12 }
 0x68f   :  { %2446 = vmatprep.subr.bf16.mxu0 %v3049_v17  ;;  %2478 = vmatprep.subr.bf16.mxu1 %v3053_v21 }
 0x692   :  { %2448 = vmatpush1.bf16.msra.mxu0 %v3057_v26  ;;  %2480 = vmatpush1.bf16.msra.mxu1 %v3061_v30 }
 0x693   :  { %2450 = vmatprep.subr.bf16.mxu0 %v3065_v35  ;;  %2482 = vmatprep.subr.bf16.mxu1 %v3069_v40 }
 0x696   :  { %2452 = vmatpush1.bf16.msra.mxu0 %v3073_v44  ;;  %2484 = vmatpush1.bf16.msra.mxu1 %v3077_v48 }
 0x697   :  { %2454 = vmatprep.subr.bf16.mxu0 %v3081_v54  ;;  %2486 = vmatprep.subr.bf16.mxu1 %v3085_v58 }
 0x69a   :  { %2456 = vmatpush1.bf16.msra.mxu0 %v3089_v59  ;;  %2488 = vmatpush1.bf16.msra.mxu1 %v3093_v61 }
 0x750   :  { %v1601_v0 = vpop.f32.mrb[12].mxu0  ;;  %v1672_v15 = vpop.f32.mrb[12].mxu1 }
 0x751   :  { %v2501_v19 = vadd.f32 %v1601_v0, %v3141_v8  ;;  %v1603_v23 = vpop.f32.mrb[13].mxu0  ;;  %v1674_v24 = vpop.f32.mrb[13].mxu1  ;;  %v2517_v45 = vadd.f32 %v1672_v15, %v3150_v38 }
 0x752   :  { %v2502_v28 = vadd.f32 %v1603_v23, %v3143_v9  ;;  %v2518_v37 = vadd.f32 %v1674_v24, %v3147_v31 }
 0x753   :  { %v1971_v32 = vmul.f32 -1.442695, %v2501_v19 }
 0x754   :  { %v1972_v36 = vmul.f32 -1.442695, %v2502_v28  ;;  %v1973_v41 = vmul.f32 -1.442695, %v2518_v37 }
 0x755   :  { %2661 = vpow2.f32 %v1971_v32 }
 0x756   :  { %2663 = vpow2.f32 %v1972_v36 }
 0x757   :  { %2665 = vpow2.f32 %v1973_v41 }
 0x758   :  { %2667 = vtanh.f32 %v2517_v45 }
 0x75f   :  { %v2662_v49 = vpop.eup %2661 }
 0x760   :  { %v2664_v53 = vpop.eup %2663  ;;  %v1684_v56 = vadd.f32 1.0, %v2662_v49 }
 0x761   :  { %v1690_v60 = vadd.f32 1.0, %v2664_v53  ;;  %v2666_v1 = vpop.eup %2665 }
 0x762   :  { %2669 = vrcp.f32 %v1684_v56  ;;  %v2668_v4 = vpop.eup %2667  ;;  %v1697_v21 = vadd.f32 1.0, %v2666_v1 }
 0x763   :  { %2671 = vrcp.f32 %v1690_v60 }
 0x764   :  { %2673 = vrcp.f32 %v1697_v21 }
 0x76c   :  { %v2670_v7 = vpop.eup %2669 }
 0x76d   :  { %v2672_v12 = vpop.eup %2671  ;;  %v1701_v17 = vmul.f32 %v2670_v7, %v2668_v4 }
 0x76e   :  { %v1700_v26 = vmul.f32 %v2672_v12, %v3366_v52  ;;  %v2674_v35 = vpop.eup %2673 }
 0x770   :  { %v1702_v30 = vadd.f32 %v1701_v17, %v1700_v26 }
 0x772   :  { %2675 = vtanh.f32 %v1702_v30 }
 0x77c   :  { %v2676_v40 = vpop.eup %2675 }
 0x77d   :  { %v1704_v44 = vmul.f32 %v2676_v40, %v2674_v35 }
 0x77f   :  { %1706 = vst [vmem:[#allocation13 + $0x30] sm:$0xff] %v1704_v44  ;;  %1777 = vmatmul.mubr.f32.vlgmr.msra.gmra.mrb[14].mxu0 %v1704_v44  ;;  %1848 = vmatmul.mubr.f32.vlgmr.msra.gmra.mrb[14].mxu1 %v1704_v44 }
 0x852   :  { %v1778_v48 = vpop.f32.mrb[14].mxu0  ;;  %v1849_v54 = vpop.f32.mrb[14].mxu1 }
 0x853   :  { %v2503_v58 = vadd.f32 %v1778_v48, %v3141_v8  ;;  %v1780_v59 = vpop.f32.mrb[15].mxu0  ;;  %v1851_v61 = vpop.f32.mrb[15].mxu1  ;;  %v2519_v3 = vadd.f32 %v1849_v54, %v3150_v38 }
 0x854   :  { %v2504_v62 = vadd.f32 %v1780_v59, %v3143_v9  ;;  %v2520_v63 = vadd.f32 %v1851_v61, %v3147_v31 }
 0x855   :  { %v1974_v13 = vmul.f32 -1.442695, %v2503_v58 }
 0x856   :  { %v1975_v14 = vmul.f32 -1.442695, %v2504_v62  ;;  %v1976_v2 = vmul.f32 -1.442695, %v2520_v63 }
 0x857   :  { %2677 = vpow2.f32 %v1974_v13 }
 0x858   :  { %2679 = vpow2.f32 %v1975_v14 }
 0x859   :  { %2681 = vpow2.f32 %v1976_v2 }
 0x85a   :  { %2683 = vtanh.f32 %v2519_v3 }
 0x861   :  { %v2678_v5 = vpop.eup %2677 }
 0x862   :  { %v2680_v16 = vpop.eup %2679  ;;  %v1861_v18 = vadd.f32 1.0, %v2678_v5 }
 0x863   :  { %v1867_v20 = vadd.f32 1.0, %v2680_v16  ;;  %v2682_v8 = vpop.eup %2681 }
 0x864   :  { %2685 = vrcp.f32 %v1861_v18  ;;  %v2684_v22 = vpop.eup %2683  ;;  %v1874_v29 = vadd.f32 1.0, %v2682_v8 }
 0x865   :  { %2687 = vrcp.f32 %v1867_v20 }
 0x866   :  { %2689 = vrcp.f32 %v1874_v29 }
 0x86e   :  { %v2686_v9 = vpop.eup %2685 }
 0x86f   :  { %v2688_v25 = vpop.eup %2687  ;;  %v1878_v27 = vmul.f32 %v2686_v9, %v2684_v22 }
 0x870   :  { %v1877_v10 = vmul.f32 %v2688_v25, %v1702_v30  ;;  %v2690_v31 = vpop.eup %2689 }
 0x872   :  { %v1879_v33 = vadd.f32 %v1878_v27, %v1877_v10 }
 0x874   :  { %2691 = vtanh.f32 %v1879_v33  ;;  %1890 = vst [vmem:[#allocation16] sm:$0xff] %v1879_v33 }
 0x87e   :  { %v2692_v38 = vpop.eup %2691 }
 0x87f   :  { %v1881_v11 = vmul.f32 %v2692_v38, %v2690_v31 }
 0x881   :  { %1883 = vst [vmem:[#allocation13 + $0x38] sm:$0xff] %v1881_v11  ;;  %1889 = vst [vmem:[#allocation14] sm:$0xff] %v1881_v11 }
 0x882   :  { %2792 = shalt.err (!%p2789_p8)
}
 0x883   :  { %s2793_s20 = scalar_lea.hbm %s3470_s7, 128 }
 0x884   :  { %p2794_p9 = scmp.ne.s32.totalorder %s3470_s7, %s2793_s20  ;;  %p2797_p10 = scmp.lt.u32.totalorder %s2793_s20, %s3470_s7 }
 0x886   :  { %p2799_p11 = pnand %p2797_p10, %p2794_p9 }
 0x888   :  { %2802 = shalt.err (!%p2799_p11)
}
 0x889   :  { %1912 = dma.vmem_to_hbm [thread:$0]  %s1910_s14, 128, %s3470_s7, [#allocation15]  }
 0x88a   :  { %s2803_s28 = scalar_lea.vmem %s3410_s16, 1024  ;;  %p2808_p13 = scmp.lt.s32.totalorder %s3410_s16, %s3410_s16 }
 0x88b   :  { %p2804_p12 = scmp.ne.s32.totalorder %s3410_s16, %s2803_s28  ;;  %p2809_p0 = scmp.lt.s32.totalorder %s2803_s28, %s2803_s28 }
 0x88d   :  { %p2810_p1 = por %p2809_p0, %p2808_p13 }
 0x88f   :  { %p2811_p2 = pnand %p2810_p1, %p2804_p12 }
 0x891   :  { %2814 = shalt.err (!%p2811_p2)
}
 0x892   :  { %s2815_s11 = scalar_lea.hbm %s3469_s6, 1024 }
 0x893   :  { %p2816_p3 = scmp.ne.s32.totalorder %s3469_s6, %s2815_s11  ;;  %p2819_p4 = scmp.lt.u32.totalorder %s2815_s11, %s3469_s6 }
 0x895   :  { %p2821_p5 = pnand %p2819_p4, %p2816_p3 }
 0x897   :  { %2824 = shalt.err (!%p2821_p5)
}
 0x898   :  { %1902 = dma.vmem_to_hbm [thread:$0]  %s3410_s16, 1024, %s3469_s6, [#allocation7], %s2859_s1, %s2859_s1, %s2860_s27  }
 0x899   :  { %s2825_s13 = scalar_lea.vmem %s3412_s18, 128  ;;  %p2830_p7 = scmp.lt.s32.totalorder %s3412_s18, %s3412_s18 }
 0x89a   :  { %p2826_p6 = scmp.ne.s32.totalorder %s3412_s18, %s2825_s13  ;;  %p2831_p8 = scmp.lt.s32.totalorder %s2825_s13, %s2825_s13 }
 0x89c   :  { %p2832_p9 = por %p2831_p8, %p2830_p7 }
 0x89e   :  { %p2833_p10 = pnand %p2832_p9, %p2826_p6 }
 0x8a0   :  { %2836 = shalt.err (!%p2833_p10)
}
 0x8a1   :  { %s2837_s15 = scalar_lea.hbm %s3471_s8, 128 }
 0x8a2   :  { %p2838_p11 = scmp.ne.s32.totalorder %s3471_s8, %s2837_s15  ;;  %p2841_p12 = scmp.lt.u32.totalorder %s2837_s15, %s3471_s8 }
 0x8a4   :  { %p2843_p13 = pnand %p2841_p12, %p2838_p11 }
 0x8a6   :  { %2846 = shalt.err (!%p2843_p13)
}
 0x8a7   :  { %1922 = dma.vmem_to_hbm [thread:$0]  %s3412_s18, 128, %s3471_s8, [#allocation15]  }
 0x8a8   :  { %2853 = dma.done.wait [#allocation7], 1024  }
 0x8a9   :  { %2854 = vsyncadd [#allocation7], 4294966272 }
 0x8aa   :  { %2855 = dma.done.wait [#allocation15], 256  }
 0x8ab   :  { %2856 = vsyncadd [#allocation15], 4294967040 }
 0x8ac   :  { %1932 = vsyncpa [#allocation6], 1 }
 0x8ad   :  { %1933 = vsyncpa [#allocation9], 1 }
 0x8ae   :  { %1934 = vsyncpa [#allocation12], 1 }
 0x8af   :  { %1935 = vsyncpa [#allocation7], 1 }
 0x8b0   :  { %1936 = vsyncpa [#allocation15], 1 }

</bundles_post_ra>
